<compile_context>
chip_gen: v7x
topology: tpu7x:2x2x1
jax: 0.10.0
libtpu: 0.0.40
codegen_flags: <defaults>
</compile_context>

<pallas_src>
import functools

import jax
import jax.numpy as jnp
from jax import lax
from jax.experimental import pallas as pl
from jax.experimental.pallas import tpu as pltpu

LN_EPS = 1e-5  # PyTorch nn.LayerNorm default


def _layer_norm(h, gamma, beta):
    mu = jnp.mean(h, axis=-1, keepdims=True)
    var = jnp.mean(jnp.square(h - mu), axis=-1, keepdims=True)
    return (h - mu) * lax.rsqrt(var + LN_EPS) * gamma + beta


def encoder_layer_kernel(x_ref,
                         wqkv_ref, bqkv_ref,      # fused QKV projection (bf16 W, f32 b)
                         wo_ref, bo_ref,          # attention output projection
                         w1_ref, b1_ref,          # FFN linear1
                         w2_ref, b2_ref,          # FFN linear2
                         g1_ref, beta1_ref,       # LayerNorm1 (gamma, beta)
                         g2_ref, beta2_ref,       # LayerNorm2 (gamma, beta)
                         out_ref,
                         ctx_ref,                 # VMEM scratch [S, D] f32
                         *, nhead, ffn_chunk):
    """One batch element of the encoder layer.

    x_ref/out_ref : (1, S, D) f32
    wqkv : (D, 3D) bf16, bqkv : (1, 3D) f32
    wo   : (D, D)  bf16, bo   : (1, D)  f32
    w1   : (D, F)  bf16, b1   : (1, F)  f32
    w2   : (F, D)  bf16, b2   : (1, D)  f32
    g1/beta1/g2/beta2 : (1, D) f32
    """
    x = x_ref[0]                      # [S, D] f32
    S, D = x.shape
    dk = D // nhead
    scale = 1.0 / (dk ** 0.5)

    # ---- Self-attention -----------------------------------------------------
    # Fused Q/K/V projection: one bf16 MXU matmul, f32 accumulation + f32 bias.
    x_bf = x.astype(jnp.bfloat16)
    qkv = jnp.dot(x_bf, wqkv_ref[...],
                  preferred_element_type=jnp.float32) + bqkv_ref[...]

    # Cast q/k/v to bf16 ONCE (hoisted out of the head loop — v5e VALU relief).
    q_bf = qkv[:, 0 * D:1 * D].astype(jnp.bfloat16)
    k_bf = qkv[:, 1 * D:2 * D].astype(jnp.bfloat16)
    v_bf = qkv[:, 2 * D:3 * D].astype(jnp.bfloat16)

    # Per-head attention.  Each head writes its context into the VMEM ctx
    # scratch at a static lane offset — no lane-axis concatenate, and the
    # accumulator chain keeps only one head's temporaries live at a time.
    # (At production dk>=128 these stores are lane-aligned / unmasked.)
    for h in range(nhead):            # nhead is a static python int -> unrolled
        lo, hi = h * dk, (h + 1) * dk
        qh, kh, vh = q_bf[:, lo:hi], k_bf[:, lo:hi], v_bf[:, lo:hi]   # [S, dk]
        # scores = qh @ kh.T / sqrt(dk)   (f32 accumulation on the MXU)
        s = lax.dot_general(qh, kh, (((1,), (1,)), ((), ())),
                            preferred_element_type=jnp.float32) * scale  # [S, S]
        s = s - jnp.max(s, axis=-1, keepdims=True)
        p = jnp.exp(s)
        # Row reciprocal on the EUP slot (free under the MXU-heavy phase).
        inv = pl.reciprocal(jnp.sum(p, axis=-1, keepdims=True), approx=True)
        attn = (p * inv).astype(jnp.bfloat16)
        ctx_ref[:, lo:hi] = jnp.dot(attn, vh,
                                    preferred_element_type=jnp.float32)

    # Output projection as ONE [S,D]@[D,D] matmul (full-D contraction -> good
    # MXU fill), bf16 operands / f32 accumulation.
    ctx_bf = ctx_ref[...].astype(jnp.bfloat16)
    attn_out = jnp.dot(ctx_bf, wo_ref[...],
                       preferred_element_type=jnp.float32) + bo_ref[...]

    # Residual + LayerNorm1 in f32 (dropout1 = identity in inference).
    h1 = _layer_norm(x + attn_out, g1_ref[...], beta1_ref[...])
    h1_bf = h1.astype(jnp.bfloat16)

    # ---- Position-wise FFN (ReLU), chunked over the F axis ------------------
    # Bounds the [S, F] ReLU temp to [S, ffn_chunk] and accumulates the w2
    # contributions in f32.
    F = w1_ref.shape[1]
    f_acc = jnp.zeros((S, D), jnp.float32)
    for c0 in range(0, F, ffn_chunk):
        c1 = c0 + ffn_chunk
        fc = jnp.dot(h1_bf, w1_ref[:, c0:c1],
                     preferred_element_type=jnp.float32) + b1_ref[:, c0:c1]
        fc = jnp.maximum(fc, 0.0).astype(jnp.bfloat16)
        f_acc = f_acc + jnp.dot(fc, w2_ref[c0:c1, :],
                                preferred_element_type=jnp.float32)
    f = f_acc + b2_ref[...]

    # Residual + LayerNorm2 (dropout2 = identity in inference).
    y = _layer_norm(h1 + f, g2_ref[...], beta2_ref[...])
    out_ref[0] = y.astype(out_ref.dtype)


def _pick_ffn_chunk(F, max_chunk=512):
    """Largest chunk <= max_chunk that divides F (falls back to F)."""
    if F <= max_chunk:
        return F
    for c in range(max_chunk, 0, -128):
        if c > 0 and F % c == 0:
            return c
    return F


def _vmem_budget_bytes(S, D, F, single_buffer_weights):
    """Generation-aware VMEM limit computed from the actual buffer sizes."""
    bf16, f32 = 2, 4
    wbuf = 1 if single_buffer_weights else 2
    weights = wbuf * bf16 * (D * 3 * D + D * D + D * F + F * D)
    small = wbuf * f32 * (3 * D + D + F + D + 4 * D)          # biases + LN params
    io = 2 * 2 * f32 * S * D                                  # x + out, double-buffered
    interm = f32 * (S * 3 * D + S * S + 4 * S * D) + f32 * S * min(F, 512)
    need = weights + small + io + interm
    budget = max(2 * need, 32 * 1024 * 1024)
    try:
        cap = getattr(pltpu.get_tpu_info(), "vmem_capacity_bytes", None)
    except Exception:
        cap = None
    if cap is None:
        cap = 64 * 1024 * 1024        # conservative default (v7x per-core VMEM)
    return int(min(budget, int(cap * 0.875)))   # leave headroom for compiler scratch


def encoder_layer_forward(x, params, *, nhead):
    """x: [B, S, D] float32 -> [B, S, D] float32 (inference forward)."""
    (wqkv, bqkv, wo, bo, w1, b1, w2, b2, g1, be1, g2, be2) = params
    B, S, D = x.shape
    F = w1.shape[1]
    assert D % nhead == 0

    # Weight matrices live in bf16 at the pallas_call boundary (MXU operands);
    # biases and LN params stay f32 (they feed the f32 VPU path only).
    bf = jnp.bfloat16
    wqkv, wo, w1, w2 = (w.astype(bf) for w in (wqkv, wo, w1, w2))
    ffn_chunk = _pick_ffn_chunk(F)

    x_spec = pl.BlockSpec((1, S, D), lambda b: (b, 0, 0))
    out_spec = pl.BlockSpec((1, S, D), lambda b: (b, 0, 0))

    def build(single_buffer_weights):
        def resident(shape):
            # Constant index map -> the block never changes across the grid;
            # Buffered(1) avoids paying for a second (never used) buffer.
            if single_buffer_weights:
                return pl.BlockSpec(shape, lambda b: (0,) * len(shape),
                                    pipeline_mode=pl.Buffered(1))
            return pl.BlockSpec(shape, lambda b: (0,) * len(shape))

        in_specs = [
            x_spec,                       # x (streamed per batch element)
            resident((D, 3 * D)),         # W_qkv (resident, bf16)
            resident((1, 3 * D)),         # b_qkv
            resident((D, D)),             # W_out
            resident((1, D)),             # b_out
            resident((D, F)),             # W_ff1
            resident((1, F)),             # b_ff1
            resident((F, D)),             # W_ff2
            resident((1, D)),             # b_ff2
            resident((1, D)),             # LN1 gamma
            resident((1, D)),             # LN1 beta
            resident((1, D)),             # LN2 gamma
            resident((1, D)),             # LN2 beta
        ]
        return pl.pallas_call(
            functools.partial(encoder_layer_kernel, nhead=nhead,
                              ffn_chunk=ffn_chunk),
            out_shape=jax.ShapeDtypeStruct((B, S, D), x.dtype),
            grid_spec=pltpu.PrefetchScalarGridSpec(
                num_scalar_prefetch=0,
                grid=(B,),
                in_specs=in_specs,
                out_specs=out_spec,
                scratch_shapes=[pltpu.VMEM((S, D), jnp.float32)],  # per-head ctx
            ),
            compiler_params=pltpu.CompilerParams(
                dimension_semantics=("parallel",),   # batch shards across cores
                vmem_limit_bytes=_vmem_budget_bytes(S, D, F, single_buffer_weights),
            ),
        )

    args = (x, wqkv, bqkv, wo, bo, w1, b1, w2, b2, g1, be1, g2, be2)
    try:
        return build(True)(*args)
    except Exception:
        # Fallback: this JAX build rejected single-buffered resident specs;
        # retry with default (double) buffering — correctness is unchanged.
        return build(False)(*args)


def init_params(key, d_model, nhead, dim_feedforward):
    """nn.Linear-style U(-1/sqrt(fan_in), 1/sqrt(fan_in)) init, weights stored [in, out]."""
    ks = jax.random.split(key, 12)

    def linear(kw, kb, fan_in, fan_out):
        s = 1.0 / jnp.sqrt(fan_in)
        w = jax.random.uniform(kw, (fan_in, fan_out), jnp.float32, -s, s)
        b = jax.random.uniform(kb, (1, fan_out), jnp.float32, -s, s)
        return w, b

    wq, bq = linear(ks[0], ks[1], d_model, d_model)
    wk, bk = linear(ks[2], ks[3], d_model, d_model)
    wv, bv = linear(ks[4], ks[5], d_model, d_model)
    wqkv = jnp.concatenate([wq, wk, wv], axis=1)         # [D, 3D]
    bqkv = jnp.concatenate([bq, bk, bv], axis=1)         # [1, 3D]
    wo, bo = linear(ks[6], ks[7], d_model, d_model)
    w1, b1 = linear(ks[8], ks[9], d_model, dim_feedforward)
    w2, b2 = linear(ks[10], ks[11], dim_feedforward, d_model)

    # Non-trivial LayerNorm affine params so the LN math is actually exercised.
    g1 = 1.0 + 0.1 * jax.random.normal(jax.random.fold_in(key, 100), (1, d_model), jnp.float32)
    be1 = 0.1 * jax.random.normal(jax.random.fold_in(key, 101), (1, d_model), jnp.float32)
    g2 = 1.0 + 0.1 * jax.random.normal(jax.random.fold_in(key, 102), (1, d_model), jnp.float32)
    be2 = 0.1 * jax.random.normal(jax.random.fold_in(key, 103), (1, d_model), jnp.float32)
    return (wqkv, bqkv, wo, bo, w1, b1, w2, b2, g1, be1, g2, be2)


def encoder_layer_reference(x, params, *, nhead):
    """Pure-JAX reference matching PyTorch EncoderLayer.forward (eval mode),
    with the kernel's mixed precision simulated: bf16 matmul operands, f32
    accumulation, f32 softmax / LayerNorm / residuals."""
    (wqkv, bqkv, wo, bo, w1, b1, w2, b2, g1, be1, g2, be2) = params
    B, S, D = x.shape
    dk = D // nhead
    bf = jnp.bfloat16

    def mm(a, b):
        return jnp.dot(a.astype(bf), b.astype(bf),
                       preferred_element_type=jnp.float32)

    qkv = mm(x, wqkv) + bqkv[0]
    q, k, v = qkv[..., :D], qkv[..., D:2 * D], qkv[..., 2 * D:]
    qh = q.reshape(B, S, nhead, dk).transpose(0, 2, 1, 3).astype(bf)
    kh = k.reshape(B, S, nhead, dk).transpose(0, 2, 1, 3).astype(bf)
    vh = v.reshape(B, S, nhead, dk).transpose(0, 2, 1, 3).astype(bf)
    scores = jnp.einsum('bhqd,bhkd->bhqk', qh, kh,
                        preferred_element_type=jnp.float32) / (dk ** 0.5)
    attn = jax.nn.softmax(scores, axis=-1).astype(bf)
    ctx = jnp.einsum('bhqk,bhkd->bhqd', attn, vh,
                     preferred_element_type=jnp.float32)
    ctx = ctx.transpose(0, 2, 1, 3).reshape(B, S, D)
    attn_out = mm(ctx, wo) + bo[0]

    def ln(h, g, b):
        mu = h.mean(-1, keepdims=True)
        var = ((h - mu) ** 2).mean(-1, keepdims=True)
        return (h - mu) * lax.rsqrt(var + LN_EPS) * g[0] + b[0]

    h1 = ln(x + attn_out, g1, be1)
    f = jnp.maximum(mm(h1, w1) + b1[0], 0.0)
    f = mm(f, w2) + b2[0]
    return ln(h1 + f, g2, be2)


if __name__ == "__main__":
    # Small, deterministic test shapes.  NOTE: for benchmarking keep D (and dk)
    # multiples of 128 so the output stores stay lane-dense.
    B, S, D_MODEL, NHEAD, DIM_FF = 2, 8, 32, 4, 64

    key = jax.random.PRNGKey(0)
    kx, kp = jax.random.split(key)

    x = jax.random.normal(kx, (B, S, D_MODEL), jnp.float32)
    params = init_params(kp, D_MODEL, NHEAD, DIM_FF)

    out = encoder_layer_forward(x, params, nhead=NHEAD)
    out = jax.block_until_ready(out)

    ref = encoder_layer_reference(x, params, nhead=NHEAD)
    assert out.shape == (B, S, D_MODEL)
    # bf16 MXU operands + approx reciprocal in the softmax -> a few e-3 diffs.
    assert jnp.allclose(out, ref, atol=2e-2, rtol=2e-2), "mismatch vs reference"

    print("KERNEL_OK")
</pallas_src>

<mosaic_0001>
module attributes {stable_mosaic.version = 11 : i64} {
  func.func @encoder_layer_kernel(%arg0: i32, %arg1: memref<1x8x32xf32, #tpu.memory_space<vmem>>, %arg2: memref<32x96xbf16, #tpu.memory_space<vmem>>, %arg3: memref<1x96xf32, #tpu.memory_space<vmem>>, %arg4: memref<32x32xbf16, #tpu.memory_space<vmem>>, %arg5: memref<1x32xf32, #tpu.memory_space<vmem>>, %arg6: memref<32x64xbf16, #tpu.memory_space<vmem>>, %arg7: memref<1x64xf32, #tpu.memory_space<vmem>>, %arg8: memref<64x32xbf16, #tpu.memory_space<vmem>>, %arg9: memref<1x32xf32, #tpu.memory_space<vmem>>, %arg10: memref<1x32xf32, #tpu.memory_space<vmem>>, %arg11: memref<1x32xf32, #tpu.memory_space<vmem>>, %arg12: memref<1x32xf32, #tpu.memory_space<vmem>>, %arg13: memref<1x32xf32, #tpu.memory_space<vmem>>, %arg14: memref<1x8x32xf32, #tpu.memory_space<vmem>>, %arg15: memref<8x32xf32, #tpu.memory_space<vmem>>) attributes {dimension_semantics = [#tpu.dimension_semantics<parallel>], iteration_bounds = array<i64: 2>, scalar_prefetch = 0 : i64, scratch_operands = 1 : i64, tpu.core_type = #tpu.core_type<tc>, window_params = [{transform_indices = @transform_0, window_bounds = array<i64: 1, 8, 32>}, {pipeline_mode = #tpu.pipeline_mode<synchronous>, transform_indices = @transform_1, window_bounds = array<i64: 32, 96>}, {pipeline_mode = #tpu.pipeline_mode<synchronous>, transform_indices = @transform_2, window_bounds = array<i64: 1, 96>}, {pipeline_mode = #tpu.pipeline_mode<synchronous>, transform_indices = @transform_3, window_bounds = array<i64: 32, 32>}, {pipeline_mode = #tpu.pipeline_mode<synchronous>, transform_indices = @transform_4, window_bounds = array<i64: 1, 32>}, {pipeline_mode = #tpu.pipeline_mode<synchronous>, transform_indices = @transform_5, window_bounds = array<i64: 32, 64>}, {pipeline_mode = #tpu.pipeline_mode<synchronous>, transform_indices = @transform_6, window_bounds = array<i64: 1, 64>}, {pipeline_mode = #tpu.pipeline_mode<synchronous>, transform_indices = @transform_7, window_bounds = array<i64: 64, 32>}, {pipeline_mode = #tpu.pipeline_mode<synchronous>, transform_indices = @transform_8, window_bounds = array<i64: 1, 32>}, {pipeline_mode = #tpu.pipeline_mode<synchronous>, transform_indices = @transform_9, window_bounds = array<i64: 1, 32>}, {pipeline_mode = #tpu.pipeline_mode<synchronous>, transform_indices = @transform_10, window_bounds = array<i64: 1, 32>}, {pipeline_mode = #tpu.pipeline_mode<synchronous>, transform_indices = @transform_11, window_bounds = array<i64: 1, 32>}, {pipeline_mode = #tpu.pipeline_mode<synchronous>, transform_indices = @transform_12, window_bounds = array<i64: 1, 32>}, {transform_indices = @transform_13, window_bounds = array<i64: 1, 8, 32>}]} {
    %c0 = arith.constant 0 : index
    %c0_0 = arith.constant 0 : index
    %c0_1 = arith.constant 0 : index
    %0 = vector.load %arg1[%c0, %c0_0, %c0_1] : memref<1x8x32xf32, #tpu.memory_space<vmem>>, vector<1x8x32xf32>
    %1 = vector.shape_cast %0 : vector<1x8x32xf32> to vector<8x32xf32>
    %2 = arith.truncf %1 : vector<8x32xf32> to vector<8x32xbf16>
    %c0_2 = arith.constant 0 : index
    %c0_3 = arith.constant 0 : index
    %3 = vector.load %arg2[%c0_2, %c0_3] : memref<32x96xbf16, #tpu.memory_space<vmem>>, vector<32x96xbf16>
    %cst = arith.constant dense<0.000000e+00> : vector<8x96xf32>
    %4 = tpu.matmul %2, %3, %cst {dimension_numbers = #tpu.dot_dimension_numbers<[1], [0], [0], [1], [0, 0, 1, 1], [], []>} : vector<8x32xbf16>, vector<32x96xbf16>, vector<8x96xf32> -> vector<8x96xf32>
    %c0_4 = arith.constant 0 : index
    %c0_5 = arith.constant 0 : index
    %5 = vector.load %arg3[%c0_4, %c0_5] : memref<1x96xf32, #tpu.memory_space<vmem>>, vector<1x96xf32>
    %6 = vector.broadcast %5 : vector<1x96xf32> to vector<8x96xf32>
    %7 = arith.addf %4, %6 : vector<8x96xf32>
    %8 = vector.extract_strided_slice %7 {offsets = [0, 0], sizes = [8, 32], strides = [1, 1]} : vector<8x96xf32> to vector<8x32xf32>
    %9 = arith.truncf %8 : vector<8x32xf32> to vector<8x32xbf16>
    %10 = vector.extract_strided_slice %7 {offsets = [0, 32], sizes = [8, 32], strides = [1, 1]} : vector<8x96xf32> to vector<8x32xf32>
    %11 = arith.truncf %10 : vector<8x32xf32> to vector<8x32xbf16>
    %12 = vector.extract_strided_slice %7 {offsets = [0, 64], sizes = [8, 32], strides = [1, 1]} : vector<8x96xf32> to vector<8x32xf32>
    %13 = arith.truncf %12 : vector<8x32xf32> to vector<8x32xbf16>
    %14 = vector.extract_strided_slice %9 {offsets = [0, 0], sizes = [8, 8], strides = [1, 1]} : vector<8x32xbf16> to vector<8x8xbf16>
    %15 = vector.extract_strided_slice %11 {offsets = [0, 0], sizes = [8, 8], strides = [1, 1]} : vector<8x32xbf16> to vector<8x8xbf16>
    %16 = vector.extract_strided_slice %13 {offsets = [0, 0], sizes = [8, 8], strides = [1, 1]} : vector<8x32xbf16> to vector<8x8xbf16>
    %cst_6 = arith.constant dense<0.000000e+00> : vector<8x8xf32>
    %17 = tpu.matmul %14, %15, %cst_6 {dimension_numbers = #tpu.dot_dimension_numbers<[1], [1], [0], [0], [0, 0, 1, 0], [], []>} : vector<8x8xbf16>, vector<8x8xbf16>, vector<8x8xf32> -> vector<8x8xf32>
    %cst_7 = arith.constant 0.353553385 : f32
    %18 = vector.broadcast %cst_7 : f32 to vector<8x8xf32>
    %19 = arith.mulf %17, %18 : vector<8x8xf32>
    %cst_8 = arith.constant dense<0xFF800000> : vector<8xf32>
    %20 = vector.multi_reduction <maximumf>, %19, %cst_8 [1] : vector<8x8xf32> to vector<8xf32>
    %21 = vector.shape_cast %20 : vector<8xf32> to vector<8x1xf32>
    %22 = vector.broadcast %21 : vector<8x1xf32> to vector<8x8xf32>
    %23 = arith.subf %19, %22 : vector<8x8xf32>
    %24 = math.exp %23 : vector<8x8xf32>
    %cst_9 = arith.constant dense<0.000000e+00> : vector<8xf32>
    %25 = vector.multi_reduction <add>, %24, %cst_9 [1] : vector<8x8xf32> to vector<8xf32>
    %26 = vector.shape_cast %25 : vector<8xf32> to vector<8x1xf32>
    %27 = tpu.reciprocal %26 {approx = true} : vector<8x1xf32> -> vector<8x1xf32>
    %28 = vector.broadcast %27 : vector<8x1xf32> to vector<8x8xf32>
    %29 = arith.mulf %24, %28 : vector<8x8xf32>
    %30 = arith.truncf %29 : vector<8x8xf32> to vector<8x8xbf16>
    %cst_10 = arith.constant dense<0.000000e+00> : vector<8x8xf32>
    %31 = tpu.matmul %30, %16, %cst_10 {dimension_numbers = #tpu.dot_dimension_numbers<[1], [0], [0], [1], [0, 0, 1, 1], [], []>} : vector<8x8xbf16>, vector<8x8xbf16>, vector<8x8xf32> -> vector<8x8xf32>
    %c0_11 = arith.constant 0 : index
    %c0_12 = arith.constant 0 : index
    %32 = vector.load %arg15[%c0_11, %c0_12] : memref<8x32xf32, #tpu.memory_space<vmem>>, vector<8x8xf32>
    tpu.vector_store %arg15[%c0_11, %c0_12], %31 {strides = array<i32>} : memref<8x32xf32, #tpu.memory_space<vmem>>, vector<8x8xf32>,
    %33 = vector.extract_strided_slice %9 {offsets = [0, 8], sizes = [8, 8], strides = [1, 1]} : vector<8x32xbf16> to vector<8x8xbf16>
    %34 = vector.extract_strided_slice %11 {offsets = [0, 8], sizes = [8, 8], strides = [1, 1]} : vector<8x32xbf16> to vector<8x8xbf16>
    %35 = vector.extract_strided_slice %13 {offsets = [0, 8], sizes = [8, 8], strides = [1, 1]} : vector<8x32xbf16> to vector<8x8xbf16>
    %cst_13 = arith.constant dense<0.000000e+00> : vector<8x8xf32>
    %36 = tpu.matmul %33, %34, %cst_13 {dimension_numbers = #tpu.dot_dimension_numbers<[1], [1], [0], [0], [0, 0, 1, 0], [], []>} : vector<8x8xbf16>, vector<8x8xbf16>, vector<8x8xf32> -> vector<8x8xf32>
    %cst_14 = arith.constant 0.353553385 : f32
    %37 = vector.broadcast %cst_14 : f32 to vector<8x8xf32>
    %38 = arith.mulf %36, %37 : vector<8x8xf32>
    %cst_15 = arith.constant dense<0xFF800000> : vector<8xf32>
    %39 = vector.multi_reduction <maximumf>, %38, %cst_15 [1] : vector<8x8xf32> to vector<8xf32>
    %40 = vector.shape_cast %39 : vector<8xf32> to vector<8x1xf32>
    %41 = vector.broadcast %40 : vector<8x1xf32> to vector<8x8xf32>
    %42 = arith.subf %38, %41 : vector<8x8xf32>
    %43 = math.exp %42 : vector<8x8xf32>
    %cst_16 = arith.constant dense<0.000000e+00> : vector<8xf32>
    %44 = vector.multi_reduction <add>, %43, %cst_16 [1] : vector<8x8xf32> to vector<8xf32>
    %45 = vector.shape_cast %44 : vector<8xf32> to vector<8x1xf32>
    %46 = tpu.reciprocal %45 {approx = true} : vector<8x1xf32> -> vector<8x1xf32>
    %47 = vector.broadcast %46 : vector<8x1xf32> to vector<8x8xf32>
    %48 = arith.mulf %43, %47 : vector<8x8xf32>
    %49 = arith.truncf %48 : vector<8x8xf32> to vector<8x8xbf16>
    %cst_17 = arith.constant dense<0.000000e+00> : vector<8x8xf32>
    %50 = tpu.matmul %49, %35, %cst_17 {dimension_numbers = #tpu.dot_dimension_numbers<[1], [0], [0], [1], [0, 0, 1, 1], [], []>} : vector<8x8xbf16>, vector<8x8xbf16>, vector<8x8xf32> -> vector<8x8xf32>
    %c0_18 = arith.constant 0 : index
    %c8 = arith.constant 8 : index
    %51 = vector.load %arg15[%c0_18, %c8] : memref<8x32xf32, #tpu.memory_space<vmem>>, vector<8x8xf32>
    tpu.vector_store %arg15[%c0_18, %c8], %50 {strides = array<i32>} : memref<8x32xf32, #tpu.memory_space<vmem>>, vector<8x8xf32>,
    %52 = vector.extract_strided_slice %9 {offsets = [0, 16], sizes = [8, 8], strides = [1, 1]} : vector<8x32xbf16> to vector<8x8xbf16>
    %53 = vector.extract_strided_slice %11 {offsets = [0, 16], sizes = [8, 8], strides = [1, 1]} : vector<8x32xbf16> to vector<8x8xbf16>
    %54 = vector.extract_strided_slice %13 {offsets = [0, 16], sizes = [8, 8], strides = [1, 1]} : vector<8x32xbf16> to vector<8x8xbf16>
    %cst_19 = arith.constant dense<0.000000e+00> : vector<8x8xf32>
    %55 = tpu.matmul %52, %53, %cst_19 {dimension_numbers = #tpu.dot_dimension_numbers<[1], [1], [0], [0], [0, 0, 1, 0], [], []>} : vector<8x8xbf16>, vector<8x8xbf16>, vector<8x8xf32> -> vector<8x8xf32>
    %cst_20 = arith.constant 0.353553385 : f32
    %56 = vector.broadcast %cst_20 : f32 to vector<8x8xf32>
    %57 = arith.mulf %55, %56 : vector<8x8xf32>
    %cst_21 = arith.constant dense<0xFF800000> : vector<8xf32>
    %58 = vector.multi_reduction <maximumf>, %57, %cst_21 [1] : vector<8x8xf32> to vector<8xf32>
    %59 = vector.shape_cast %58 : vector<8xf32> to vector<8x1xf32>
    %60 = vector.broadcast %59 : vector<8x1xf32> to vector<8x8xf32>
    %61 = arith.subf %57, %60 : vector<8x8xf32>
    %62 = math.exp %61 : vector<8x8xf32>
    %cst_22 = arith.constant dense<0.000000e+00> : vector<8xf32>
    %63 = vector.multi_reduction <add>, %62, %cst_22 [1] : vector<8x8xf32> to vector<8xf32>
    %64 = vector.shape_cast %63 : vector<8xf32> to vector<8x1xf32>
    %65 = tpu.reciprocal %64 {approx = true} : vector<8x1xf32> -> vector<8x1xf32>
    %66 = vector.broadcast %65 : vector<8x1xf32> to vector<8x8xf32>
    %67 = arith.mulf %62, %66 : vector<8x8xf32>
    %68 = arith.truncf %67 : vector<8x8xf32> to vector<8x8xbf16>
    %cst_23 = arith.constant dense<0.000000e+00> : vector<8x8xf32>
    %69 = tpu.matmul %68, %54, %cst_23 {dimension_numbers = #tpu.dot_dimension_numbers<[1], [0], [0], [1], [0, 0, 1, 1], [], []>} : vector<8x8xbf16>, vector<8x8xbf16>, vector<8x8xf32> -> vector<8x8xf32>
    %c0_24 = arith.constant 0 : index
    %c16 = arith.constant 16 : index
    %70 = vector.load %arg15[%c0_24, %c16] : memref<8x32xf32, #tpu.memory_space<vmem>>, vector<8x8xf32>
    tpu.vector_store %arg15[%c0_24, %c16], %69 {strides = array<i32>} : memref<8x32xf32, #tpu.memory_space<vmem>>, vector<8x8xf32>,
    %71 = vector.extract_strided_slice %9 {offsets = [0, 24], sizes = [8, 8], strides = [1, 1]} : vector<8x32xbf16> to vector<8x8xbf16>
    %72 = vector.extract_strided_slice %11 {offsets = [0, 24], sizes = [8, 8], strides = [1, 1]} : vector<8x32xbf16> to vector<8x8xbf16>
    %73 = vector.extract_strided_slice %13 {offsets = [0, 24], sizes = [8, 8], strides = [1, 1]} : vector<8x32xbf16> to vector<8x8xbf16>
    %cst_25 = arith.constant dense<0.000000e+00> : vector<8x8xf32>
    %74 = tpu.matmul %71, %72, %cst_25 {dimension_numbers = #tpu.dot_dimension_numbers<[1], [1], [0], [0], [0, 0, 1, 0], [], []>} : vector<8x8xbf16>, vector<8x8xbf16>, vector<8x8xf32> -> vector<8x8xf32>
    %cst_26 = arith.constant 0.353553385 : f32
    %75 = vector.broadcast %cst_26 : f32 to vector<8x8xf32>
    %76 = arith.mulf %74, %75 : vector<8x8xf32>
    %cst_27 = arith.constant dense<0xFF800000> : vector<8xf32>
    %77 = vector.multi_reduction <maximumf>, %76, %cst_27 [1] : vector<8x8xf32> to vector<8xf32>
    %78 = vector.shape_cast %77 : vector<8xf32> to vector<8x1xf32>
    %79 = vector.broadcast %78 : vector<8x1xf32> to vector<8x8xf32>
    %80 = arith.subf %76, %79 : vector<8x8xf32>
    %81 = math.exp %80 : vector<8x8xf32>
    %cst_28 = arith.constant dense<0.000000e+00> : vector<8xf32>
    %82 = vector.multi_reduction <add>, %81, %cst_28 [1] : vector<8x8xf32> to vector<8xf32>
    %83 = vector.shape_cast %82 : vector<8xf32> to vector<8x1xf32>
    %84 = tpu.reciprocal %83 {approx = true} : vector<8x1xf32> -> vector<8x1xf32>
    %85 = vector.broadcast %84 : vector<8x1xf32> to vector<8x8xf32>
    %86 = arith.mulf %81, %85 : vector<8x8xf32>
    %87 = arith.truncf %86 : vector<8x8xf32> to vector<8x8xbf16>
    %cst_29 = arith.constant dense<0.000000e+00> : vector<8x8xf32>
    %88 = tpu.matmul %87, %73, %cst_29 {dimension_numbers = #tpu.dot_dimension_numbers<[1], [0], [0], [1], [0, 0, 1, 1], [], []>} : vector<8x8xbf16>, vector<8x8xbf16>, vector<8x8xf32> -> vector<8x8xf32>
    %c0_30 = arith.constant 0 : index
    %c24 = arith.constant 24 : index
    %89 = vector.load %arg15[%c0_30, %c24] : memref<8x32xf32, #tpu.memory_space<vmem>>, vector<8x8xf32>
    tpu.vector_store %arg15[%c0_30, %c24], %88 {strides = array<i32>} : memref<8x32xf32, #tpu.memory_space<vmem>>, vector<8x8xf32>,
    %c0_31 = arith.constant 0 : index
    %c0_32 = arith.constant 0 : index
    %90 = vector.load %arg15[%c0_31, %c0_32] : memref<8x32xf32, #tpu.memory_space<vmem>>, vector<8x32xf32>
    %91 = arith.truncf %90 : vector<8x32xf32> to vector<8x32xbf16>
    %c0_33 = arith.constant 0 : index
    %c0_34 = arith.constant 0 : index
    %92 = vector.load %arg4[%c0_33, %c0_34] : memref<32x32xbf16, #tpu.memory_space<vmem>>, vector<32x32xbf16>
    %cst_35 = arith.constant dense<0.000000e+00> : vector<8x32xf32>
    %93 = tpu.matmul %91, %92, %cst_35 {dimension_numbers = #tpu.dot_dimension_numbers<[1], [0], [0], [1], [0, 0, 1, 1], [], []>} : vector<8x32xbf16>, vector<32x32xbf16>, vector<8x32xf32> -> vector<8x32xf32>
    %c0_36 = arith.constant 0 : index
    %c0_37 = arith.constant 0 : index
    %94 = vector.load %arg5[%c0_36, %c0_37] : memref<1x32xf32, #tpu.memory_space<vmem>>, vector<1x32xf32>
    %95 = vector.broadcast %94 : vector<1x32xf32> to vector<8x32xf32>
    %96 = arith.addf %93, %95 : vector<8x32xf32>
    %97 = arith.addf %1, %96 : vector<8x32xf32>
    %c0_38 = arith.constant 0 : index
    %c0_39 = arith.constant 0 : index
    %98 = vector.load %arg10[%c0_38, %c0_39] : memref<1x32xf32, #tpu.memory_space<vmem>>, vector<1x32xf32>
    %c0_40 = arith.constant 0 : index
    %c0_41 = arith.constant 0 : index
    %99 = vector.load %arg11[%c0_40, %c0_41] : memref<1x32xf32, #tpu.memory_space<vmem>>, vector<1x32xf32>
    %cst_42 = arith.constant dense<0.000000e+00> : vector<8xf32>
    %100 = vector.multi_reduction <add>, %97, %cst_42 [1] : vector<8x32xf32> to vector<8xf32>
    %101 = vector.shape_cast %100 : vector<8xf32> to vector<8x1xf32>
    %cst_43 = arith.constant 3.200000e+01 : f32
    %102 = vector.broadcast %cst_43 : f32 to vector<8x1xf32>
    %103 = arith.divf %101, %102 : vector<8x1xf32>
    %104 = vector.broadcast %103 : vector<8x1xf32> to vector<8x32xf32>
    %105 = arith.subf %97, %104 : vector<8x32xf32>
    %106 = arith.mulf %105, %105 : vector<8x32xf32>
    %cst_44 = arith.constant dense<0.000000e+00> : vector<8xf32>
    %107 = vector.multi_reduction <add>, %106, %cst_44 [1] : vector<8x32xf32> to vector<8xf32>
    %108 = vector.shape_cast %107 : vector<8xf32> to vector<8x1xf32>
    %cst_45 = arith.constant 3.200000e+01 : f32
    %109 = vector.broadcast %cst_45 : f32 to vector<8x1xf32>
    %110 = arith.divf %108, %109 : vector<8x1xf32>
    %111 = vector.broadcast %103 : vector<8x1xf32> to vector<8x32xf32>
    %112 = arith.subf %97, %111 : vector<8x32xf32>
    %cst_46 = arith.constant 9.99999974E-6 : f32
    %113 = vector.broadcast %cst_46 : f32 to vector<8x1xf32>
    %114 = arith.addf %110, %113 : vector<8x1xf32>
    %115 = math.rsqrt %114 : vector<8x1xf32>
    %116 = vector.broadcast %115 : vector<8x1xf32> to vector<8x32xf32>
    %117 = arith.mulf %112, %116 : vector<8x32xf32>
    %118 = vector.broadcast %98 : vector<1x32xf32> to vector<8x32xf32>
    %119 = arith.mulf %117, %118 : vector<8x32xf32>
    %120 = vector.broadcast %99 : vector<1x32xf32> to vector<8x32xf32>
    %121 = arith.addf %119, %120 : vector<8x32xf32>
    %122 = arith.truncf %121 : vector<8x32xf32> to vector<8x32xbf16>
    %cst_47 = arith.constant 0.000000e+00 : f32
    %123 = vector.broadcast %cst_47 : f32 to vector<8x32xf32>
    %c0_48 = arith.constant 0 : index
    %c0_49 = arith.constant 0 : index
    %124 = vector.load %arg6[%c0_48, %c0_49] : memref<32x64xbf16, #tpu.memory_space<vmem>>, vector<32x64xbf16>
    %cst_50 = arith.constant dense<0.000000e+00> : vector<8x64xf32>
    %125 = tpu.matmul %122, %124, %cst_50 {dimension_numbers = #tpu.dot_dimension_numbers<[1], [0], [0], [1], [0, 0, 1, 1], [], []>} : vector<8x32xbf16>, vector<32x64xbf16>, vector<8x64xf32> -> vector<8x64xf32>
    %c0_51 = arith.constant 0 : index
    %c0_52 = arith.constant 0 : index
    %126 = vector.load %arg7[%c0_51, %c0_52] : memref<1x64xf32, #tpu.memory_space<vmem>>, vector<1x64xf32>
    %127 = vector.broadcast %126 : vector<1x64xf32> to vector<8x64xf32>
    %128 = arith.addf %125, %127 : vector<8x64xf32>
    %cst_53 = arith.constant 0.000000e+00 : f32
    %129 = vector.broadcast %cst_53 : f32 to vector<8x64xf32>
    %130 = arith.maximumf %128, %129 : vector<8x64xf32>
    %131 = arith.truncf %130 : vector<8x64xf32> to vector<8x64xbf16>
    %c0_54 = arith.constant 0 : index
    %c0_55 = arith.constant 0 : index
    %132 = vector.load %arg8[%c0_54, %c0_55] : memref<64x32xbf16, #tpu.memory_space<vmem>>, vector<64x32xbf16>
    %cst_56 = arith.constant dense<0.000000e+00> : vector<8x32xf32>
    %133 = tpu.matmul %131, %132, %cst_56 {dimension_numbers = #tpu.dot_dimension_numbers<[1], [0], [0], [1], [0, 0, 1, 1], [], []>} : vector<8x64xbf16>, vector<64x32xbf16>, vector<8x32xf32> -> vector<8x32xf32>
    %134 = arith.addf %123, %133 : vector<8x32xf32>
    %c0_57 = arith.constant 0 : index
    %c0_58 = arith.constant 0 : index
    %135 = vector.load %arg9[%c0_57, %c0_58] : memref<1x32xf32, #tpu.memory_space<vmem>>, vector<1x32xf32>
    %136 = vector.broadcast %135 : vector<1x32xf32> to vector<8x32xf32>
    %137 = arith.addf %134, %136 : vector<8x32xf32>
    %138 = arith.addf %121, %137 : vector<8x32xf32>
    %c0_59 = arith.constant 0 : index
    %c0_60 = arith.constant 0 : index
    %139 = vector.load %arg12[%c0_59, %c0_60] : memref<1x32xf32, #tpu.memory_space<vmem>>, vector<1x32xf32>
    %c0_61 = arith.constant 0 : index
    %c0_62 = arith.constant 0 : index
    %140 = vector.load %arg13[%c0_61, %c0_62] : memref<1x32xf32, #tpu.memory_space<vmem>>, vector<1x32xf32>
    %cst_63 = arith.constant dense<0.000000e+00> : vector<8xf32>
    %141 = vector.multi_reduction <add>, %138, %cst_63 [1] : vector<8x32xf32> to vector<8xf32>
    %142 = vector.shape_cast %141 : vector<8xf32> to vector<8x1xf32>
    %cst_64 = arith.constant 3.200000e+01 : f32
    %143 = vector.broadcast %cst_64 : f32 to vector<8x1xf32>
    %144 = arith.divf %142, %143 : vector<8x1xf32>
    %145 = vector.broadcast %144 : vector<8x1xf32> to vector<8x32xf32>
    %146 = arith.subf %138, %145 : vector<8x32xf32>
    %147 = arith.mulf %146, %146 : vector<8x32xf32>
    %cst_65 = arith.constant dense<0.000000e+00> : vector<8xf32>
    %148 = vector.multi_reduction <add>, %147, %cst_65 [1] : vector<8x32xf32> to vector<8xf32>
    %149 = vector.shape_cast %148 : vector<8xf32> to vector<8x1xf32>
    %cst_66 = arith.constant 3.200000e+01 : f32
    %150 = vector.broadcast %cst_66 : f32 to vector<8x1xf32>
    %151 = arith.divf %149, %150 : vector<8x1xf32>
    %152 = vector.broadcast %144 : vector<8x1xf32> to vector<8x32xf32>
    %153 = arith.subf %138, %152 : vector<8x32xf32>
    %cst_67 = arith.constant 9.99999974E-6 : f32
    %154 = vector.broadcast %cst_67 : f32 to vector<8x1xf32>
    %155 = arith.addf %151, %154 : vector<8x1xf32>
    %156 = math.rsqrt %155 : vector<8x1xf32>
    %157 = vector.broadcast %156 : vector<8x1xf32> to vector<8x32xf32>
    %158 = arith.mulf %153, %157 : vector<8x32xf32>
    %159 = vector.broadcast %139 : vector<1x32xf32> to vector<8x32xf32>
    %160 = arith.mulf %158, %159 : vector<8x32xf32>
    %161 = vector.broadcast %140 : vector<1x32xf32> to vector<8x32xf32>
    %162 = arith.addf %160, %161 : vector<8x32xf32>
    %c0_68 = arith.constant 0 : index
    %c0_69 = arith.constant 0 : index
    %c0_70 = arith.constant 0 : index
    %163 = vector.load %arg14[%c0_68, %c0_69, %c0_70] : memref<1x8x32xf32, #tpu.memory_space<vmem>>, vector<1x8x32xf32>
    %164 = vector.shape_cast %163 : vector<1x8x32xf32> to vector<8x32xf32>
    %165 = vector.shape_cast %162 : vector<8x32xf32> to vector<1x8x32xf32>
    tpu.vector_store %arg14[%c0_68, %c0_69, %c0_70], %165 {strides = array<i32>} : memref<1x8x32xf32, #tpu.memory_space<vmem>>, vector<1x8x32xf32>,
    return
  }
  func.func @transform_0(%arg0: i32) -> (i32, i32, i32) {
    %c0_i32 = arith.constant 0 : i32
    %c0_i32_0 = arith.constant 0 : i32
    %c0_i32_1 = arith.constant 0 : i32
    return %arg0, %c0_i32, %c0_i32_0 : i32, i32, i32
  }
  func.func @transform_1(%arg0: i32) -> (i32, i32) {
    %c0_i32 = arith.constant 0 : i32
    %c0_i32_0 = arith.constant 0 : i32
    %c0_i32_1 = arith.constant 0 : i32
    return %c0_i32, %c0_i32_0 : i32, i32
  }
  func.func @transform_2(%arg0: i32) -> (i32, i32) {
    %c0_i32 = arith.constant 0 : i32
    %c0_i32_0 = arith.constant 0 : i32
    %c0_i32_1 = arith.constant 0 : i32
    return %c0_i32, %c0_i32_0 : i32, i32
  }
  func.func @transform_3(%arg0: i32) -> (i32, i32) {
    %c0_i32 = arith.constant 0 : i32
    %c0_i32_0 = arith.constant 0 : i32
    %c0_i32_1 = arith.constant 0 : i32
    return %c0_i32, %c0_i32_0 : i32, i32
  }
  func.func @transform_4(%arg0: i32) -> (i32, i32) {
    %c0_i32 = arith.constant 0 : i32
    %c0_i32_0 = arith.constant 0 : i32
    %c0_i32_1 = arith.constant 0 : i32
    return %c0_i32, %c0_i32_0 : i32, i32
  }
  func.func @transform_5(%arg0: i32) -> (i32, i32) {
    %c0_i32 = arith.constant 0 : i32
    %c0_i32_0 = arith.constant 0 : i32
    %c0_i32_1 = arith.constant 0 : i32
    return %c0_i32, %c0_i32_0 : i32, i32
  }
  func.func @transform_6(%arg0: i32) -> (i32, i32) {
    %c0_i32 = arith.constant 0 : i32
    %c0_i32_0 = arith.constant 0 : i32
    %c0_i32_1 = arith.constant 0 : i32
    return %c0_i32, %c0_i32_0 : i32, i32
  }
  func.func @transform_7(%arg0: i32) -> (i32, i32) {
    %c0_i32 = arith.constant 0 : i32
    %c0_i32_0 = arith.constant 0 : i32
    %c0_i32_1 = arith.constant 0 : i32
    return %c0_i32, %c0_i32_0 : i32, i32
  }
  func.func @transform_8(%arg0: i32) -> (i32, i32) {
    %c0_i32 = arith.constant 0 : i32
    %c0_i32_0 = arith.constant 0 : i32
    %c0_i32_1 = arith.constant 0 : i32
    return %c0_i32, %c0_i32_0 : i32, i32
  }
  func.func @transform_9(%arg0: i32) -> (i32, i32) {
    %c0_i32 = arith.constant 0 : i32
    %c0_i32_0 = arith.constant 0 : i32
    %c0_i32_1 = arith.constant 0 : i32
    return %c0_i32, %c0_i32_0 : i32, i32
  }
  func.func @transform_10(%arg0: i32) -> (i32, i32) {
    %c0_i32 = arith.constant 0 : i32
    %c0_i32_0 = arith.constant 0 : i32
    %c0_i32_1 = arith.constant 0 : i32
    return %c0_i32, %c0_i32_0 : i32, i32
  }
  func.func @transform_11(%arg0: i32) -> (i32, i32) {
    %c0_i32 = arith.constant 0 : i32
    %c0_i32_0 = arith.constant 0 : i32
    %c0_i32_1 = arith.constant 0 : i32
    return %c0_i32, %c0_i32_0 : i32, i32
  }
  func.func @transform_12(%arg0: i32) -> (i32, i32) {
    %c0_i32 = arith.constant 0 : i32
    %c0_i32_0 = arith.constant 0 : i32
    %c0_i32_1 = arith.constant 0 : i32
    return %c0_i32, %c0_i32_0 : i32, i32
  }
  func.func @transform_13(%arg0: i32) -> (i32, i32, i32) {
    %c0_i32 = arith.constant 0 : i32
    %c0_i32_0 = arith.constant 0 : i32
    %c0_i32_1 = arith.constant 0 : i32
    return %arg0, %c0_i32, %c0_i32_0 : i32, i32, i32
  }
}

module attributes {stable_mosaic.version = 11 : i64} {
  func.func @encoder_layer_kernel(%arg0: i32, %arg1: memref<1x8x32xf32, #tpu.memory_space<vmem>>, %arg2: memref<32x96xbf16, #tpu.memory_space<vmem>>, %arg3: memref<1x96xf32, #tpu.memory_space<vmem>>, %arg4: memref<32x32xbf16, #tpu.memory_space<vmem>>, %arg5: memref<1x32xf32, #tpu.memory_space<vmem>>, %arg6: memref<32x64xbf16, #tpu.memory_space<vmem>>, %arg7: memref<1x64xf32, #tpu.memory_space<vmem>>, %arg8: memref<64x32xbf16, #tpu.memory_space<vmem>>, %arg9: memref<1x32xf32, #tpu.memory_space<vmem>>, %arg10: memref<1x32xf32, #tpu.memory_space<vmem>>, %arg11: memref<1x32xf32, #tpu.memory_space<vmem>>, %arg12: memref<1x32xf32, #tpu.memory_space<vmem>>, %arg13: memref<1x32xf32, #tpu.memory_space<vmem>>, %arg14: memref<1x8x32xf32, #tpu.memory_space<vmem>>, %arg15: memref<8x32xf32, #tpu.memory_space<vmem>>) attributes {dimension_semantics = [#tpu.dimension_semantics<parallel>], iteration_bounds = array<i64: 2>, scalar_prefetch = 0 : i64, scratch_operands = 1 : i64, tpu.core_type = #tpu.core_type<tc>, window_params = [{transform_indices = @transform_0, window_bounds = array<i64: 1, 8, 32>}, {pipeline_mode = #tpu.pipeline_mode<synchronous>, transform_indices = @transform_1, window_bounds = array<i64: 32, 96>}, {pipeline_mode = #tpu.pipeline_mode<synchronous>, transform_indices = @transform_2, window_bounds = array<i64: 1, 96>}, {pipeline_mode = #tpu.pipeline_mode<synchronous>, transform_indices = @transform_3, window_bounds = array<i64: 32, 32>}, {pipeline_mode = #tpu.pipeline_mode<synchronous>, transform_indices = @transform_4, window_bounds = array<i64: 1, 32>}, {pipeline_mode = #tpu.pipeline_mode<synchronous>, transform_indices = @transform_5, window_bounds = array<i64: 32, 64>}, {pipeline_mode = #tpu.pipeline_mode<synchronous>, transform_indices = @transform_6, window_bounds = array<i64: 1, 64>}, {pipeline_mode = #tpu.pipeline_mode<synchronous>, transform_indices = @transform_7, window_bounds = array<i64: 64, 32>}, {pipeline_mode = #tpu.pipeline_mode<synchronous>, transform_indices = @transform_8, window_bounds = array<i64: 1, 32>}, {pipeline_mode = #tpu.pipeline_mode<synchronous>, transform_indices = @transform_9, window_bounds = array<i64: 1, 32>}, {pipeline_mode = #tpu.pipeline_mode<synchronous>, transform_indices = @transform_10, window_bounds = array<i64: 1, 32>}, {pipeline_mode = #tpu.pipeline_mode<synchronous>, transform_indices = @transform_11, window_bounds = array<i64: 1, 32>}, {pipeline_mode = #tpu.pipeline_mode<synchronous>, transform_indices = @transform_12, window_bounds = array<i64: 1, 32>}, {transform_indices = @transform_13, window_bounds = array<i64: 1, 8, 32>}]} {
    %c0 = arith.constant 0 : index
    %c0_0 = arith.constant 0 : index
    %c0_1 = arith.constant 0 : index
    %0 = vector.load %arg1[%c0, %c0_0, %c0_1] : memref<1x8x32xf32, #tpu.memory_space<vmem>>, vector<1x8x32xf32>
    %1 = vector.shape_cast %0 : vector<1x8x32xf32> to vector<8x32xf32>
    %2 = arith.truncf %1 : vector<8x32xf32> to vector<8x32xbf16>
    %c0_2 = arith.constant 0 : index
    %c0_3 = arith.constant 0 : index
    %3 = vector.load %arg2[%c0_2, %c0_3] : memref<32x96xbf16, #tpu.memory_space<vmem>>, vector<32x96xbf16>
    %cst = arith.constant dense<0.000000e+00> : vector<8x96xf32>
    %4 = tpu.matmul %2, %3, %cst {dimension_numbers = #tpu.dot_dimension_numbers<[1], [0], [0], [1], [0, 0, 1, 1], [], []>} : vector<8x32xbf16>, vector<32x96xbf16>, vector<8x96xf32> -> vector<8x96xf32>
    %c0_4 = arith.constant 0 : index
    %c0_5 = arith.constant 0 : index
    %5 = vector.load %arg3[%c0_4, %c0_5] : memref<1x96xf32, #tpu.memory_space<vmem>>, vector<1x96xf32>
    %6 = vector.broadcast %5 : vector<1x96xf32> to vector<8x96xf32>
    %7 = arith.addf %4, %6 : vector<8x96xf32>
    %8 = vector.extract_strided_slice %7 {offsets = [0, 0], sizes = [8, 32], strides = [1, 1]} : vector<8x96xf32> to vector<8x32xf32>
    %9 = arith.truncf %8 : vector<8x32xf32> to vector<8x32xbf16>
    %10 = vector.extract_strided_slice %7 {offsets = [0, 32], sizes = [8, 32], strides = [1, 1]} : vector<8x96xf32> to vector<8x32xf32>
    %11 = arith.truncf %10 : vector<8x32xf32> to vector<8x32xbf16>
    %12 = vector.extract_strided_slice %7 {offsets = [0, 64], sizes = [8, 32], strides = [1, 1]} : vector<8x96xf32> to vector<8x32xf32>
    %13 = arith.truncf %12 : vector<8x32xf32> to vector<8x32xbf16>
    %14 = vector.extract_strided_slice %9 {offsets = [0, 0], sizes = [8, 8], strides = [1, 1]} : vector<8x32xbf16> to vector<8x8xbf16>
    %15 = vector.extract_strided_slice %11 {offsets = [0, 0], sizes = [8, 8], strides = [1, 1]} : vector<8x32xbf16> to vector<8x8xbf16>
    %16 = vector.extract_strided_slice %13 {offsets = [0, 0], sizes = [8, 8], strides = [1, 1]} : vector<8x32xbf16> to vector<8x8xbf16>
    %cst_6 = arith.constant dense<0.000000e+00> : vector<8x8xf32>
    %17 = tpu.matmul %14, %15, %cst_6 {dimension_numbers = #tpu.dot_dimension_numbers<[1], [1], [0], [0], [0, 0, 1, 0], [], []>} : vector<8x8xbf16>, vector<8x8xbf16>, vector<8x8xf32> -> vector<8x8xf32>
    %cst_7 = arith.constant 0.353553385 : f32
    %18 = vector.broadcast %cst_7 : f32 to vector<8x8xf32>
    %19 = arith.mulf %17, %18 : vector<8x8xf32>
    %cst_8 = arith.constant dense<0xFF800000> : vector<8xf32>
    %20 = vector.multi_reduction <maximumf>, %19, %cst_8 [1] : vector<8x8xf32> to vector<8xf32>
    %21 = vector.shape_cast %20 : vector<8xf32> to vector<8x1xf32>
    %22 = vector.broadcast %21 : vector<8x1xf32> to vector<8x8xf32>
    %23 = arith.subf %19, %22 : vector<8x8xf32>
    %24 = math.exp %23 : vector<8x8xf32>
    %cst_9 = arith.constant dense<0.000000e+00> : vector<8xf32>
    %25 = vector.multi_reduction <add>, %24, %cst_9 [1] : vector<8x8xf32> to vector<8xf32>
    %26 = vector.shape_cast %25 : vector<8xf32> to vector<8x1xf32>
    %27 = tpu.reciprocal %26 {approx = true} : vector<8x1xf32> -> vector<8x1xf32>
    %28 = vector.broadcast %27 : vector<8x1xf32> to vector<8x8xf32>
    %29 = arith.mulf %24, %28 : vector<8x8xf32>
    %30 = arith.truncf %29 : vector<8x8xf32> to vector<8x8xbf16>
    %cst_10 = arith.constant dense<0.000000e+00> : vector<8x8xf32>
    %31 = tpu.matmul %30, %16, %cst_10 {dimension_numbers = #tpu.dot_dimension_numbers<[1], [0], [0], [1], [0, 0, 1, 1], [], []>} : vector<8x8xbf16>, vector<8x8xbf16>, vector<8x8xf32> -> vector<8x8xf32>
    %c0_11 = arith.constant 0 : index
    %c0_12 = arith.constant 0 : index
    %32 = vector.load %arg15[%c0_11, %c0_12] : memref<8x32xf32, #tpu.memory_space<vmem>>, vector<8x8xf32>
    tpu.vector_store %arg15[%c0_11, %c0_12], %31 {strides = array<i32>} : memref<8x32xf32, #tpu.memory_space<vmem>>, vector<8x8xf32>,
    %33 = vector.extract_strided_slice %9 {offsets = [0, 8], sizes = [8, 8], strides = [1, 1]} : vector<8x32xbf16> to vector<8x8xbf16>
    %34 = vector.extract_strided_slice %11 {offsets = [0, 8], sizes = [8, 8], strides = [1, 1]} : vector<8x32xbf16> to vector<8x8xbf16>
    %35 = vector.extract_strided_slice %13 {offsets = [0, 8], sizes = [8, 8], strides = [1, 1]} : vector<8x32xbf16> to vector<8x8xbf16>
    %cst_13 = arith.constant dense<0.000000e+00> : vector<8x8xf32>
    %36 = tpu.matmul %33, %34, %cst_13 {dimension_numbers = #tpu.dot_dimension_numbers<[1], [1], [0], [0], [0, 0, 1, 0], [], []>} : vector<8x8xbf16>, vector<8x8xbf16>, vector<8x8xf32> -> vector<8x8xf32>
    %cst_14 = arith.constant 0.353553385 : f32
    %37 = vector.broadcast %cst_14 : f32 to vector<8x8xf32>
    %38 = arith.mulf %36, %37 : vector<8x8xf32>
    %cst_15 = arith.constant dense<0xFF800000> : vector<8xf32>
    %39 = vector.multi_reduction <maximumf>, %38, %cst_15 [1] : vector<8x8xf32> to vector<8xf32>
    %40 = vector.shape_cast %39 : vector<8xf32> to vector<8x1xf32>
    %41 = vector.broadcast %40 : vector<8x1xf32> to vector<8x8xf32>
    %42 = arith.subf %38, %41 : vector<8x8xf32>
    %43 = math.exp %42 : vector<8x8xf32>
    %cst_16 = arith.constant dense<0.000000e+00> : vector<8xf32>
    %44 = vector.multi_reduction <add>, %43, %cst_16 [1] : vector<8x8xf32> to vector<8xf32>
    %45 = vector.shape_cast %44 : vector<8xf32> to vector<8x1xf32>
    %46 = tpu.reciprocal %45 {approx = true} : vector<8x1xf32> -> vector<8x1xf32>
    %47 = vector.broadcast %46 : vector<8x1xf32> to vector<8x8xf32>
    %48 = arith.mulf %43, %47 : vector<8x8xf32>
    %49 = arith.truncf %48 : vector<8x8xf32> to vector<8x8xbf16>
    %cst_17 = arith.constant dense<0.000000e+00> : vector<8x8xf32>
    %50 = tpu.matmul %49, %35, %cst_17 {dimension_numbers = #tpu.dot_dimension_numbers<[1], [0], [0], [1], [0, 0, 1, 1], [], []>} : vector<8x8xbf16>, vector<8x8xbf16>, vector<8x8xf32> -> vector<8x8xf32>
    %c0_18 = arith.constant 0 : index
    %c8 = arith.constant 8 : index
    %51 = vector.load %arg15[%c0_18, %c8] : memref<8x32xf32, #tpu.memory_space<vmem>>, vector<8x8xf32>
    tpu.vector_store %arg15[%c0_18, %c8], %50 {strides = array<i32>} : memref<8x32xf32, #tpu.memory_space<vmem>>, vector<8x8xf32>,
    %52 = vector.extract_strided_slice %9 {offsets = [0, 16], sizes = [8, 8], strides = [1, 1]} : vector<8x32xbf16> to vector<8x8xbf16>
    %53 = vector.extract_strided_slice %11 {offsets = [0, 16], sizes = [8, 8], strides = [1, 1]} : vector<8x32xbf16> to vector<8x8xbf16>
    %54 = vector.extract_strided_slice %13 {offsets = [0, 16], sizes = [8, 8], strides = [1, 1]} : vector<8x32xbf16> to vector<8x8xbf16>
    %cst_19 = arith.constant dense<0.000000e+00> : vector<8x8xf32>
    %55 = tpu.matmul %52, %53, %cst_19 {dimension_numbers = #tpu.dot_dimension_numbers<[1], [1], [0], [0], [0, 0, 1, 0], [], []>} : vector<8x8xbf16>, vector<8x8xbf16>, vector<8x8xf32> -> vector<8x8xf32>
    %cst_20 = arith.constant 0.353553385 : f32
    %56 = vector.broadcast %cst_20 : f32 to vector<8x8xf32>
    %57 = arith.mulf %55, %56 : vector<8x8xf32>
    %cst_21 = arith.constant dense<0xFF800000> : vector<8xf32>
    %58 = vector.multi_reduction <maximumf>, %57, %cst_21 [1] : vector<8x8xf32> to vector<8xf32>
    %59 = vector.shape_cast %58 : vector<8xf32> to vector<8x1xf32>
    %60 = vector.broadcast %59 : vector<8x1xf32> to vector<8x8xf32>
    %61 = arith.subf %57, %60 : vector<8x8xf32>
    %62 = math.exp %61 : vector<8x8xf32>
    %cst_22 = arith.constant dense<0.000000e+00> : vector<8xf32>
    %63 = vector.multi_reduction <add>, %62, %cst_22 [1] : vector<8x8xf32> to vector<8xf32>
    %64 = vector.shape_cast %63 : vector<8xf32> to vector<8x1xf32>
    %65 = tpu.reciprocal %64 {approx = true} : vector<8x1xf32> -> vector<8x1xf32>
    %66 = vector.broadcast %65 : vector<8x1xf32> to vector<8x8xf32>
    %67 = arith.mulf %62, %66 : vector<8x8xf32>
    %68 = arith.truncf %67 : vector<8x8xf32> to vector<8x8xbf16>
    %cst_23 = arith.constant dense<0.000000e+00> : vector<8x8xf32>
    %69 = tpu.matmul %68, %54, %cst_23 {dimension_numbers = #tpu.dot_dimension_numbers<[1], [0], [0], [1], [0, 0, 1, 1], [], []>} : vector<8x8xbf16>, vector<8x8xbf16>, vector<8x8xf32> -> vector<8x8xf32>
    %c0_24 = arith.constant 0 : index
    %c16 = arith.constant 16 : index
    %70 = vector.load %arg15[%c0_24, %c16] : memref<8x32xf32, #tpu.memory_space<vmem>>, vector<8x8xf32>
    tpu.vector_store %arg15[%c0_24, %c16], %69 {strides = array<i32>} : memref<8x32xf32, #tpu.memory_space<vmem>>, vector<8x8xf32>,
    %71 = vector.extract_strided_slice %9 {offsets = [0, 24], sizes = [8, 8], strides = [1, 1]} : vector<8x32xbf16> to vector<8x8xbf16>
    %72 = vector.extract_strided_slice %11 {offsets = [0, 24], sizes = [8, 8], strides = [1, 1]} : vector<8x32xbf16> to vector<8x8xbf16>
    %73 = vector.extract_strided_slice %13 {offsets = [0, 24], sizes = [8, 8], strides = [1, 1]} : vector<8x32xbf16> to vector<8x8xbf16>
    %cst_25 = arith.constant dense<0.000000e+00> : vector<8x8xf32>
    %74 = tpu.matmul %71, %72, %cst_25 {dimension_numbers = #tpu.dot_dimension_numbers<[1], [1], [0], [0], [0, 0, 1, 0], [], []>} : vector<8x8xbf16>, vector<8x8xbf16>, vector<8x8xf32> -> vector<8x8xf32>
    %cst_26 = arith.constant 0.353553385 : f32
    %75 = vector.broadcast %cst_26 : f32 to vector<8x8xf32>
    %76 = arith.mulf %74, %75 : vector<8x8xf32>
    %cst_27 = arith.constant dense<0xFF800000> : vector<8xf32>
    %77 = vector.multi_reduction <maximumf>, %76, %cst_27 [1] : vector<8x8xf32> to vector<8xf32>
    %78 = vector.shape_cast %77 : vector<8xf32> to vector<8x1xf32>
    %79 = vector.broadcast %78 : vector<8x1xf32> to vector<8x8xf32>
    %80 = arith.subf %76, %79 : vector<8x8xf32>
    %81 = math.exp %80 : vector<8x8xf32>
    %cst_28 = arith.constant dense<0.000000e+00> : vector<8xf32>
    %82 = vector.multi_reduction <add>, %81, %cst_28 [1] : vector<8x8xf32> to vector<8xf32>
    %83 = vector.shape_cast %82 : vector<8xf32> to vector<8x1xf32>
    %84 = tpu.reciprocal %83 {approx = true} : vector<8x1xf32> -> vector<8x1xf32>
    %85 = vector.broadcast %84 : vector<8x1xf32> to vector<8x8xf32>
    %86 = arith.mulf %81, %85 : vector<8x8xf32>
    %87 = arith.truncf %86 : vector<8x8xf32> to vector<8x8xbf16>
    %cst_29 = arith.constant dense<0.000000e+00> : vector<8x8xf32>
    %88 = tpu.matmul %87, %73, %cst_29 {dimension_numbers = #tpu.dot_dimension_numbers<[1], [0], [0], [1], [0, 0, 1, 1], [], []>} : vector<8x8xbf16>, vector<8x8xbf16>, vector<8x8xf32> -> vector<8x8xf32>
    %c0_30 = arith.constant 0 : index
    %c24 = arith.constant 24 : index
    %89 = vector.load %arg15[%c0_30, %c24] : memref<8x32xf32, #tpu.memory_space<vmem>>, vector<8x8xf32>
    tpu.vector_store %arg15[%c0_30, %c24], %88 {strides = array<i32>} : memref<8x32xf32, #tpu.memory_space<vmem>>, vector<8x8xf32>,
    %c0_31 = arith.constant 0 : index
    %c0_32 = arith.constant 0 : index
    %90 = vector.load %arg15[%c0_31, %c0_32] : memref<8x32xf32, #tpu.memory_space<vmem>>, vector<8x32xf32>
    %91 = arith.truncf %90 : vector<8x32xf32> to vector<8x32xbf16>
    %c0_33 = arith.constant 0 : index
    %c0_34 = arith.constant 0 : index
    %92 = vector.load %arg4[%c0_33, %c0_34] : memref<32x32xbf16, #tpu.memory_space<vmem>>, vector<32x32xbf16>
    %cst_35 = arith.constant dense<0.000000e+00> : vector<8x32xf32>
    %93 = tpu.matmul %91, %92, %cst_35 {dimension_numbers = #tpu.dot_dimension_numbers<[1], [0], [0], [1], [0, 0, 1, 1], [], []>} : vector<8x32xbf16>, vector<32x32xbf16>, vector<8x32xf32> -> vector<8x32xf32>
    %c0_36 = arith.constant 0 : index
    %c0_37 = arith.constant 0 : index
    %94 = vector.load %arg5[%c0_36, %c0_37] : memref<1x32xf32, #tpu.memory_space<vmem>>, vector<1x32xf32>
    %95 = vector.broadcast %94 : vector<1x32xf32> to vector<8x32xf32>
    %96 = arith.addf %93, %95 : vector<8x32xf32>
    %97 = arith.addf %1, %96 : vector<8x32xf32>
    %c0_38 = arith.constant 0 : index
    %c0_39 = arith.constant 0 : index
    %98 = vector.load %arg10[%c0_38, %c0_39] : memref<1x32xf32, #tpu.memory_space<vmem>>, vector<1x32xf32>
    %c0_40 = arith.constant 0 : index
    %c0_41 = arith.constant 0 : index
    %99 = vector.load %arg11[%c0_40, %c0_41] : memref<1x32xf32, #tpu.memory_space<vmem>>, vector<1x32xf32>
    %cst_42 = arith.constant dense<0.000000e+00> : vector<8xf32>
    %100 = vector.multi_reduction <add>, %97, %cst_42 [1] : vector<8x32xf32> to vector<8xf32>
    %101 = vector.shape_cast %100 : vector<8xf32> to vector<8x1xf32>
    %cst_43 = arith.constant 3.200000e+01 : f32
    %102 = vector.broadcast %cst_43 : f32 to vector<8x1xf32>
    %103 = arith.divf %101, %102 : vector<8x1xf32>
    %104 = vector.broadcast %103 : vector<8x1xf32> to vector<8x32xf32>
    %105 = arith.subf %97, %104 : vector<8x32xf32>
    %106 = arith.mulf %105, %105 : vector<8x32xf32>
    %cst_44 = arith.constant dense<0.000000e+00> : vector<8xf32>
    %107 = vector.multi_reduction <add>, %106, %cst_44 [1] : vector<8x32xf32> to vector<8xf32>
    %108 = vector.shape_cast %107 : vector<8xf32> to vector<8x1xf32>
    %cst_45 = arith.constant 3.200000e+01 : f32
    %109 = vector.broadcast %cst_45 : f32 to vector<8x1xf32>
    %110 = arith.divf %108, %109 : vector<8x1xf32>
    %111 = vector.broadcast %103 : vector<8x1xf32> to vector<8x32xf32>
    %112 = arith.subf %97, %111 : vector<8x32xf32>
    %cst_46 = arith.constant 9.99999974E-6 : f32
    %113 = vector.broadcast %cst_46 : f32 to vector<8x1xf32>
    %114 = arith.addf %110, %113 : vector<8x1xf32>
    %115 = math.rsqrt %114 : vector<8x1xf32>
    %116 = vector.broadcast %115 : vector<8x1xf32> to vector<8x32xf32>
    %117 = arith.mulf %112, %116 : vector<8x32xf32>
    %118 = vector.broadcast %98 : vector<1x32xf32> to vector<8x32xf32>
    %119 = arith.mulf %117, %118 : vector<8x32xf32>
    %120 = vector.broadcast %99 : vector<1x32xf32> to vector<8x32xf32>
    %121 = arith.addf %119, %120 : vector<8x32xf32>
    %122 = arith.truncf %121 : vector<8x32xf32> to vector<8x32xbf16>
    %cst_47 = arith.constant 0.000000e+00 : f32
    %123 = vector.broadcast %cst_47 : f32 to vector<8x32xf32>
    %c0_48 = arith.constant 0 : index
    %c0_49 = arith.constant 0 : index
    %124 = vector.load %arg6[%c0_48, %c0_49] : memref<32x64xbf16, #tpu.memory_space<vmem>>, vector<32x64xbf16>
    %cst_50 = arith.constant dense<0.000000e+00> : vector<8x64xf32>
    %125 = tpu.matmul %122, %124, %cst_50 {dimension_numbers = #tpu.dot_dimension_numbers<[1], [0], [0], [1], [0, 0, 1, 1], [], []>} : vector<8x32xbf16>, vector<32x64xbf16>, vector<8x64xf32> -> vector<8x64xf32>
    %c0_51 = arith.constant 0 : index
    %c0_52 = arith.constant 0 : index
    %126 = vector.load %arg7[%c0_51, %c0_52] : memref<1x64xf32, #tpu.memory_space<vmem>>, vector<1x64xf32>
    %127 = vector.broadcast %126 : vector<1x64xf32> to vector<8x64xf32>
    %128 = arith.addf %125, %127 : vector<8x64xf32>
    %cst_53 = arith.constant 0.000000e+00 : f32
    %129 = vector.broadcast %cst_53 : f32 to vector<8x64xf32>
    %130 = arith.maximumf %128, %129 : vector<8x64xf32>
    %131 = arith.truncf %130 : vector<8x64xf32> to vector<8x64xbf16>
    %c0_54 = arith.constant 0 : index
    %c0_55 = arith.constant 0 : index
    %132 = vector.load %arg8[%c0_54, %c0_55] : memref<64x32xbf16, #tpu.memory_space<vmem>>, vector<64x32xbf16>
    %cst_56 = arith.constant dense<0.000000e+00> : vector<8x32xf32>
    %133 = tpu.matmul %131, %132, %cst_56 {dimension_numbers = #tpu.dot_dimension_numbers<[1], [0], [0], [1], [0, 0, 1, 1], [], []>} : vector<8x64xbf16>, vector<64x32xbf16>, vector<8x32xf32> -> vector<8x32xf32>
    %134 = arith.addf %123, %133 : vector<8x32xf32>
    %c0_57 = arith.constant 0 : index
    %c0_58 = arith.constant 0 : index
    %135 = vector.load %arg9[%c0_57, %c0_58] : memref<1x32xf32, #tpu.memory_space<vmem>>, vector<1x32xf32>
    %136 = vector.broadcast %135 : vector<1x32xf32> to vector<8x32xf32>
    %137 = arith.addf %134, %136 : vector<8x32xf32>
    %138 = arith.addf %121, %137 : vector<8x32xf32>
    %c0_59 = arith.constant 0 : index
    %c0_60 = arith.constant 0 : index
    %139 = vector.load %arg12[%c0_59, %c0_60] : memref<1x32xf32, #tpu.memory_space<vmem>>, vector<1x32xf32>
    %c0_61 = arith.constant 0 : index
    %c0_62 = arith.constant 0 : index
    %140 = vector.load %arg13[%c0_61, %c0_62] : memref<1x32xf32, #tpu.memory_space<vmem>>, vector<1x32xf32>
    %cst_63 = arith.constant dense<0.000000e+00> : vector<8xf32>
    %141 = vector.multi_reduction <add>, %138, %cst_63 [1] : vector<8x32xf32> to vector<8xf32>
    %142 = vector.shape_cast %141 : vector<8xf32> to vector<8x1xf32>
    %cst_64 = arith.constant 3.200000e+01 : f32
    %143 = vector.broadcast %cst_64 : f32 to vector<8x1xf32>
    %144 = arith.divf %142, %143 : vector<8x1xf32>
    %145 = vector.broadcast %144 : vector<8x1xf32> to vector<8x32xf32>
    %146 = arith.subf %138, %145 : vector<8x32xf32>
    %147 = arith.mulf %146, %146 : vector<8x32xf32>
    %cst_65 = arith.constant dense<0.000000e+00> : vector<8xf32>
    %148 = vector.multi_reduction <add>, %147, %cst_65 [1] : vector<8x32xf32> to vector<8xf32>
    %149 = vector.shape_cast %148 : vector<8xf32> to vector<8x1xf32>
    %cst_66 = arith.constant 3.200000e+01 : f32
    %150 = vector.broadcast %cst_66 : f32 to vector<8x1xf32>
    %151 = arith.divf %149, %150 : vector<8x1xf32>
    %152 = vector.broadcast %144 : vector<8x1xf32> to vector<8x32xf32>
    %153 = arith.subf %138, %152 : vector<8x32xf32>
    %cst_67 = arith.constant 9.99999974E-6 : f32
    %154 = vector.broadcast %cst_67 : f32 to vector<8x1xf32>
    %155 = arith.addf %151, %154 : vector<8x1xf32>
    %156 = math.rsqrt %155 : vector<8x1xf32>
    %157 = vector.broadcast %156 : vector<8x1xf32> to vector<8x32xf32>
    %158 = arith.mulf %153, %157 : vector<8x32xf32>
    %159 = vector.broadcast %139 : vector<1x32xf32> to vector<8x32xf32>
    %160 = arith.mulf %158, %159 : vector<8x32xf32>
    %161 = vector.broadcast %140 : vector<1x32xf32> to vector<8x32xf32>
    %162 = arith.addf %160, %161 : vector<8x32xf32>
    %c0_68 = arith.constant 0 : index
    %c0_69 = arith.constant 0 : index
    %c0_70 = arith.constant 0 : index
    %163 = vector.load %arg14[%c0_68, %c0_69, %c0_70] : memref<1x8x32xf32, #tpu.memory_space<vmem>>, vector<1x8x32xf32>
    %164 = vector.shape_cast %163 : vector<1x8x32xf32> to vector<8x32xf32>
    %165 = vector.shape_cast %162 : vector<8x32xf32> to vector<1x8x32xf32>
    tpu.vector_store %arg14[%c0_68, %c0_69, %c0_70], %165 {strides = array<i32>} : memref<1x8x32xf32, #tpu.memory_space<vmem>>, vector<1x8x32xf32>,
    return
  }
  func.func @transform_0(%arg0: i32) -> (i32, i32, i32) {
    %c0_i32 = arith.constant 0 : i32
    %c0_i32_0 = arith.constant 0 : i32
    %c0_i32_1 = arith.constant 0 : i32
    return %arg0, %c0_i32, %c0_i32_0 : i32, i32, i32
  }
  func.func @transform_1(%arg0: i32) -> (i32, i32) {
    %c0_i32 = arith.constant 0 : i32
    %c0_i32_0 = arith.constant 0 : i32
    %c0_i32_1 = arith.constant 0 : i32
    return %c0_i32, %c0_i32_0 : i32, i32
  }
  func.func @transform_2(%arg0: i32) -> (i32, i32) {
    %c0_i32 = arith.constant 0 : i32
    %c0_i32_0 = arith.constant 0 : i32
    %c0_i32_1 = arith.constant 0 : i32
    return %c0_i32, %c0_i32_0 : i32, i32
  }
  func.func @transform_3(%arg0: i32) -> (i32, i32) {
    %c0_i32 = arith.constant 0 : i32
    %c0_i32_0 = arith.constant 0 : i32
    %c0_i32_1 = arith.constant 0 : i32
    return %c0_i32, %c0_i32_0 : i32, i32
  }
  func.func @transform_4(%arg0: i32) -> (i32, i32) {
    %c0_i32 = arith.constant 0 : i32
    %c0_i32_0 = arith.constant 0 : i32
    %c0_i32_1 = arith.constant 0 : i32
    return %c0_i32, %c0_i32_0 : i32, i32
  }
  func.func @transform_5(%arg0: i32) -> (i32, i32) {
    %c0_i32 = arith.constant 0 : i32
    %c0_i32_0 = arith.constant 0 : i32
    %c0_i32_1 = arith.constant 0 : i32
    return %c0_i32, %c0_i32_0 : i32, i32
  }
  func.func @transform_6(%arg0: i32) -> (i32, i32) {
    %c0_i32 = arith.constant 0 : i32
    %c0_i32_0 = arith.constant 0 : i32
    %c0_i32_1 = arith.constant 0 : i32
    return %c0_i32, %c0_i32_0 : i32, i32
  }
  func.func @transform_7(%arg0: i32) -> (i32, i32) {
    %c0_i32 = arith.constant 0 : i32
    %c0_i32_0 = arith.constant 0 : i32
    %c0_i32_1 = arith.constant 0 : i32
    return %c0_i32, %c0_i32_0 : i32, i32
  }
  func.func @transform_8(%arg0: i32) -> (i32, i32) {
    %c0_i32 = arith.constant 0 : i32
    %c0_i32_0 = arith.constant 0 : i32
    %c0_i32_1 = arith.constant 0 : i32
    return %c0_i32, %c0_i32_0 : i32, i32
  }
  func.func @transform_9(%arg0: i32) -> (i32, i32) {
    %c0_i32 = arith.constant 0 : i32
    %c0_i32_0 = arith.constant 0 : i32
    %c0_i32_1 = arith.constant 0 : i32
    return %c0_i32, %c0_i32_0 : i32, i32
  }
  func.func @transform_10(%arg0: i32) -> (i32, i32) {
    %c0_i32 = arith.constant 0 : i32
    %c0_i32_0 = arith.constant 0 : i32
    %c0_i32_1 = arith.constant 0 : i32
    return %c0_i32, %c0_i32_0 : i32, i32
  }
  func.func @transform_11(%arg0: i32) -> (i32, i32) {
    %c0_i32 = arith.constant 0 : i32
    %c0_i32_0 = arith.constant 0 : i32
    %c0_i32_1 = arith.constant 0 : i32
    return %c0_i32, %c0_i32_0 : i32, i32
  }
  func.func @transform_12(%arg0: i32) -> (i32, i32) {
    %c0_i32 = arith.constant 0 : i32
    %c0_i32_0 = arith.constant 0 : i32
    %c0_i32_1 = arith.constant 0 : i32
    return %c0_i32, %c0_i32_0 : i32, i32
  }
  func.func @transform_13(%arg0: i32) -> (i32, i32, i32) {
    %c0_i32 = arith.constant 0 : i32
    %c0_i32_0 = arith.constant 0 : i32
    %c0_i32_1 = arith.constant 0 : i32
    return %arg0, %c0_i32, %c0_i32_0 : i32, i32, i32
  }
}

</mosaic_0001>

<bundles_post_ra>
// kernel: tpu_custom_call.1
= control target key start
LH: loop header
LB: loop body
LE: loop exit
PB: predicated region body
PF: predicated region fallthrough
CT: control target
= control target key end

     0   :  { %s2070_s0 = inlined_call_operand.vmem [shape: f32[2,8,32], index: 0, kind: input, shape index: {}]   ;;  %s2071_s1 = inlined_call_operand.vmem [shape: bf16[32,96], index: 1, kind: input, shape index: {}]   ;;  %s2072_s2 = inlined_call_operand.vmem [shape: f32[1,96], index: 2, kind: input, shape index: {}]   ;;  %s2073_s3 = inlined_call_operand.vmem [shape: bf16[32,32], index: 3, kind: input, shape index: {}]   ;;  %s2074_s4 = inlined_call_operand.vmem [shape: f32[1,32], index: 4, kind: input, shape index: {}]   ;;  %s2075_s5 = inlined_call_operand.hbm [shape: bf16[32,64], index: 5, kind: input, shape index: {}]   ;;  %s2076_s6 = inlined_call_operand.vmem [shape: f32[1,64], index: 6, kind: input, shape index: {}]   ;;  %s2077_s7 = inlined_call_operand.vmem [shape: bf16[64,32], index: 7, kind: input, shape index: {}]   ;;  %s2078_s8 = inlined_call_operand.vmem [shape: f32[1,32], index: 8, kind: input, shape index: {}]   ;;  %s2079_s9 = inlined_call_operand.vmem [shape: f32[1,32], index: 9, kind: input, shape index: {}]   ;;  %s2080_s10 = inlined_call_operand.vmem [shape: f32[1,32], index: 10, kind: input, shape index: {}]   ;;  %s2081_s11 = inlined_call_operand.vmem [shape: f32[1,32], index: 11, kind: input, shape index: {}]   ;;  %s2082_s12 = inlined_call_operand.vmem [shape: f32[1,32], index: 12, kind: input, shape index: {}]   ;;  %s2083_s13 = inlined_call_operand.hbm [shape: f32[2,8,32], index: 13, kind: output, shape index: {}]  }
   0x1   :  { %2090 = sst [smem:[#allocation12_spill]] %s2070_s0 }
   0x2   :  { %18 = vsyncpa [#allocation4], 0 }
   0x3   :  { %19 = vsyncpa [#allocation5], 0 }
   0x4   :  { %21 = vsyncpa [#allocation5 + $0x1], 0  ;;  %s1793_s25 = smov 0   ;;  %s1795_s26 = smov 0  }
   0x5   :  { %s1797_s27 = smov 0   ;;  %s1799_s28 = smov 0  }
   0x6 LB: > { %2091 = sst [smem:[#allocation9_spill]] %s1697_s27  ;;  %s1814_s29 = sadd.s32 4294967295, %s1701_s28   ;;  %s1701_s28 = sphi %s1799_s28, %s2104_s28   ;;  %s1697_s27 = sphi %s1797_s27, %s2106_s27   ;;  %s1693_s26 = sphi %s1795_s26, %s2108_s26   ;;  %s1689_s25 = sphi %s1793_s25, %s2107_s25  }
   0x7   : > { %s1353_s30 = sadd.s32 4294967294, %s1701_s28   ;;  %s1818_s14 = sadd.s32 1, %s1701_s28  }
   0x8   : > { %2092 = sst [smem:[#allocation10_spill]] %s1818_s14  ;;  %s312_s15 = sadd.s32 1, %s1697_s27 }
   0x9   : > { %s309_s16 = ssub.s32 %s1701_s28, %s1818_s14  ;;  %p322_p0 = scmp.ne.s32.totalorder %s1697_s27, %s1693_s26 }
   0xa   : > { %p310_p1 = scmp.eq.s32.totalorder %s309_s16, 0  ;;  %p323_p2 = scmp.eq.s32.totalorder %s1814_s29, 1 }
   0xb   : > { %p328_p3 = scmp.ne.s32.totalorder %s1693_s26, %s1689_s25  ;;  %p329_p4 = scmp.eq.s32.totalorder %s1353_s30, 1 }
   0xc   : > { %s1829_s17 = scalar_select %p310_p1, %s1697_s27, %s312_s15  }
   0xd   : > { %p1831_p5 = por %p323_p2, %p322_p0  ;;  %p1835_p6 = por %p329_p4, %p328_p3 }
   0xe   : > { %2093 = sst [smem:[#allocation11_spill]] %s1829_s17  ;;  %p1354_p7 = scmp.ge.s32.totalorder %s1701_s28, 1 }
   0xf   : > { %s2094_s18 = scalar_select %p1831_p5, 1, 0 }
  0x10   : > { %s2095_s19 = scalar_select %p1835_p6, 1, 0 }
  0x11   : > { %p336_p8 = scmp.lt.s32.totalorder %s1701_s28, 3  ;;  %p2087_p9 = scmp.eq.s32.totalorder %s1814_s29, 0 }
  0x12   : > { %s1703_s21 = smov [#allocation3]   ;;  %s1607_s15 = scalar_lea.hbm %s2075_s5, 256 }
  0x13   : > { %p1842_p10 = pnand %p1354_p7, %p336_p8  ;;  %s360_s22 = sshll.u32 %s1703_s21, 4  ;;  %s361_s22 = int_to_ptr.vmem [resolvable:$true] %s360_s22 }
  0x14   : > { %p1608_p13 = scmp.ne.s32.totalorder %s2075_s5, %s1607_s15  ;;  %p1614_p3 = scmp.lt.u32.totalorder %s1607_s15, %s2075_s5 }
  0x15   : > { %s2096_s20 = scalar_select %p1842_p10, 1, 0 }
  0x16   : > { %p1515_p11 = pneg %p1842_p10 }
  0x18   : > { %p1850_p12 = pnand %p2087_p9, %p1515_p11 }
  0x1a   : > { %p1609_p0 = pneg %p1850_p12 }
  0x1c   : > { %p1610_p1 = pnand %p1609_p0, %p1608_p13 }
  0x1e   : > { %p1611_p2 = pneg %p1610_p1 }
  0x20   : > { %p1616_p4 = pnand %p1614_p3, %p1611_p2 }
  0x22   : > { %1619 = shalt.err (!%p1616_p4)
}
  0x23   : > { %s1620_s14 = scalar_lea.vmem %s361_s22, 256  ;;  %p1628_p9 = scmp.lt.s32.totalorder %s361_s22, %s361_s22 }
  0x24   : > { %p1621_p7 = scmp.ne.s32.totalorder %s361_s22, %s1620_s14  ;;  %p1629_p6 = scmp.lt.s32.totalorder %s1620_s14, %s1620_s14 }
  0x26   : > { %p1623_p8 = pnand %p1621_p7, %p1609_p0  ;;  %p1630_p5 = por %p1629_p6, %p1628_p9 }
  0x28   : > { %p1624_p11 = pneg %p1623_p8 }
  0x2a   : > { %p1631_p10 = pnand %p1630_p5, %p1624_p11 }
  0x2c   : > { %1634 = shalt.err (!%p1631_p10)
}
  0x2d   : > { %s1704_s17 = smov 64   ;;  %s1705_s24 = smov 4  }
  0x2e   : > { %1518 = dma.hbm_to_vmem [thread:$0]  (!%p1850_p12), %s2075_s5, 256, %s361_s22, [#allocation4], %s1704_s17, %s1704_s17, %s1705_s24  }
  0x2f   : > { %p2098_p13 = scmp.ne.s32.totalorder %s2096_s20, 0 }
  0x30   : > { %p2099_p1 = scmp.eq.s32.totalorder (!%p2098_p13), %s1814_s29, 0 }
  0x31   : > { %404 = sbr.rel (%p2098_p13) target bundleno = 2627 (0xa43), region = 72 }
  0x38   : > { %1680 = dma.done.wait (%p2099_p1), [#allocation4], 256   ;;  %p2100_p0 = pmov %p2099_p1 }
  0x39   : > { %p447_p5 = scmp.lt.s32.totalorder %s1814_s29, 1  ;;  %v1706_v0 = vmov 0.0   ;;  %vm1707_vm0 = vmmov 0   ;;  %s2101_s0 = sld [smem:[#allocation12_spill]]  ;;  %v1577_v1 = vld [vmem:[%s2071_s1] sm:$0xff]   ;;  %v1578_v2 = vld [vmem:[%s2071_s1 + $0x8] sm:$0xff]  }
  0x3a   : > { %1682 = vsyncadd (%p2100_p0), [#allocation4], 4294967040  ;;  %1425 = vmatprep.subr.bf16.mxu0 %v1706_v0  ;;  %1429 = vmatprep.mubr.msk.bf16.mxu0 %vm1707_vm0, %v1706_v0  ;;  %vm477_vm1 = vcmask 261120   ;;  %v1361_v5 = vld [vmem:[%s2072_s2] ss:$0 sm:$0xff]  ;;  %s1710_s20 = smov 80  }
  0x3b   : > { %s448_s27 = scalar_select %p447_p5, %s1814_s29, 1  ;;  %1433 = vmatprep.subr.bf16.mxu1 %v1706_v0  ;;  %1435 = vmatprep.mubr.msk.bf16.mxu1 %vm1707_vm0, %v1706_v0  ;;  %vm525_vm2 = vcmask 64512   ;;  %vm590_vm3 = vcmask 1043456   ;;  %vm750_vm4 = vcmask 130112   ;;  %vm867_vm5 = vcmask 195712  }
  0x3c   : > { %1426 = vmatpush3.bf16.msra.mxu0 %v1577_v1  ;;  %s1711_s22 = smov 88   ;;  %s1713_s15 = smov 112   ;;  %vm984_vm6 = vcmask 261312   ;;  %vm1193_vm7 = vcmask 523264  }
  0x3d   : > { %s1360_s14 = sshll.u32 %s448_s27, 3  ;;  %1427 = vmatprep.subr.bf16.mxu0 %v1706_v0  ;;  %s1708_s27 = smov 120  }
  0x3e   : > { %s1714_s21 = smov 104   ;;  %s1715_s17 = smov 56  }
  0x3f   : > { %s450_s23 = scalar_lea.vmem %s2101_s0, %s1360_s14  ;;  %s1709_s14 = smov 96  }
  0x40   : > { %v1893_v3 = vld [vmem:[%s450_s23] sm:$0xff]  ;;  %1428 = vmatpush3.bf16.msra.mxu0 %v1578_v2  ;;  %s1712_s23 = smov 72   ;;  %s1716_s24 = smov 64  }
  0x41   : > { %v453_v4 = vpack.c.bf16 %v1893_v3, %v1893_v3  ;;  %1439 = vmatprep.subr.bf16.mxu0 %v1706_v0  ;;  %s1717_s30 = smov 40   ;;  %s1718_s16 = smov 48  }
  0x42   : > { %p2102_p9 = scmp.ne.s32.totalorder %s2094_s18, 0 }
  0x43   : > { %1430 = vmatmul.mubr.msk.bf16.vlgmr.msra.gmra.mrb[0].mxu0 %vm477_vm1, %v453_v4 }
  0x44   : > { %1441 = vmatprep.mubr.msk.bf16.mxu0 %vm1707_vm0, %v1706_v0 }
 0x116   : > { %v515_v6 = vpop.f32.mrb[0].mxu0 }
 0x117   : > { %v516_v7 = vadd.f32 %v1361_v5, %v515_v6  ;;  %v1431_v8 = vpop.f32.mrb[1].mxu0 }
 0x118   : > { %v518_v9 = vpop.f32.mrb[2].mxu0 }
 0x119   : > { %v1905_v10 = vpack.c.bf16 %v516_v7, %v516_v7  ;;  %v1432_v11 = vpop.f32.mrb[3].mxu0 }
 0x11b   : > { %635 = vrot.lane.b32.xlu1 %v1905_v10, %s1708_s27  ;;  %523 = vrot.lane.b32.xlu0 %v1905_v10, %s1709_s14  ;;  %s1719_s27 = smov 8  }
 0x11f   : > { %754 = vrot.lane.b32.xlu1 %v1905_v10, %s1710_s20  ;;  %637 = vrot.lane.b32.xlu0 %v1905_v10, %s1711_s22  ;;  %s444_s22 = sand.u32 1, %s1693_s26  }
 0x123   : > { %871 = vrot.lane.b32.xlu1 %v1905_v10, %s1712_s23  ;;  %752 = vrot.lane.b32.xlu0 %v1905_v10, %s1713_s15  ;;  %s1720_s15 = smov 16   ;;  %s1359_s23 = sshll.u32 %s444_s22, 3 }
 0x127   : > { %869 = vrot.lane.b32.xlu0 %v1905_v10, %s1714_s21  ;;  %s1721_s21 = smov 24  }
 0x18d   : > { %v524_v12 = vpop.permute.xlu0 %523  ;;  %v636_v15 = vpop.permute.xlu1 %635 }
 0x18e   : > { %v530_v13 = vsel %vm525_vm2, %v524_v12, 0 }
 0x18f   : > { %1434 = vmatpush3.bf16.xpose.msra.mxu1 %v530_v13 }
 0x190   : > { %1445 = vmatprep.subr.bf16.mxu1 %v1706_v0 }
 0x191   : > { %v638_v14 = vpop.permute.xlu0 %637  ;;  %v755_v17 = vpop.permute.xlu1 %754 }
 0x192   : > { %v643_v16 = vsel %vm525_vm2, %v638_v14, 0  ;;  %v760_v18 = vsel %vm525_vm2, %v755_v17, 0 }
 0x195   : > { %v872_v19 = vpop.permute.xlu1 %871  ;;  %v753_v20 = vpop.permute.xlu0 %752 }
 0x196   : > { %1436 = vmatmul.mubr.msk.bf16.vlgmr.msra.gmra.mrb[0].mxu1 %vm525_vm2, %v1905_v10  ;;  %v877_v21 = vsel %vm525_vm2, %v872_v19, 0 }
 0x197   : > { %1446 = vmatpush3.bf16.xpose.msra.mxu1 %v643_v16  ;;  %1447 = vmatprep.mubr.msk.bf16.mxu1 %vm1707_vm0, %v1706_v0 }
 0x198   : > { %1457 = vmatprep.subr.bf16.mxu1 %v1706_v0 }
 0x199   : > { %v870_v22 = vpop.permute.xlu0 %869 }
 0x19e   : > { %1448 = vmatmul.mubr.msk.bf16.vlgmr.msra.gmra.mrb[4].mxu1 %vm525_vm2, %v636_v15 }
 0x19f   : > { %1458 = vmatpush3.bf16.xpose.msra.mxu1 %v760_v18  ;;  %1459 = vmatprep.mubr.msk.bf16.mxu1 %vm1707_vm0, %v1706_v0 }
 0x1a0   : > { %1469 = vmatprep.subr.bf16.mxu1 %v1706_v0 }
 0x1a6   : > { %1460 = vmatmul.mubr.msk.bf16.vlgmr.msra.gmra.mrb[8].mxu1 %vm525_vm2, %v753_v20 }
 0x1a7   : > { %1470 = vmatpush3.bf16.xpose.msra.mxu1 %v877_v21  ;;  %1471 = vmatprep.mubr.msk.bf16.mxu1 %vm1707_vm0, %v1706_v0 }
 0x1a8   : > { %1481 = vmatprep.subr.bf16.mxu1 %v1706_v0 }
 0x1ae   : > { %1472 = vmatmul.mubr.msk.bf16.vlgmr.msra.gmra.mrb[12].mxu1 %vm525_vm2, %v870_v22 }
 0x1af   : > { %1485 = vmatprep.mubr.msk.bf16.mxu1 %vm1707_vm0, %v1706_v0 }
 0x269   : > { %v566_v23 = vpop.f32.mrb[0].mxu1 }
 0x26a   : > { %v572_v24 = vmul.f32 0.35355338, %v566_v23  ;;  %v1437_v25 = vpop.f32.mrb[1].mxu1 }
 0x26b   : > { %v569_v26 = vpop.f32.mrb[2].mxu1 }
 0x26c   : > { %v1438_v27 = vpop.f32.mrb[3].mxu1  ;;  %v573_v28 = vsel %vm525_vm2, %v572_v24, -inf }
 0x26d   : > { %574 = vmax.xlane.f32.xlu1 %v573_v28 }
 0x271   : > { %v679_v29 = vpop.f32.mrb[4].mxu1 }
 0x272   : > { %v685_v30 = vmul.f32 0.35355338, %v679_v29  ;;  %v1449_v31 = vpop.f32.mrb[5].mxu1 }
 0x273   : > { %v682_v32 = vpop.f32.mrb[6].mxu1 }
 0x274   : > { %v1450_v33 = vpop.f32.mrb[7].mxu1  ;;  %v686_v34 = vsel %vm525_vm2, %v685_v30, -inf }
 0x275   : > { %687 = vmax.xlane.f32.xlu0 %v686_v34 }
 0x279   : > { %v796_v35 = vpop.f32.mrb[8].mxu1 }
 0x27a   : > { %v802_v36 = vmul.f32 0.35355338, %v796_v35  ;;  %v1461_v37 = vpop.f32.mrb[9].mxu1 }
 0x27b   : > { %v799_v38 = vpop.f32.mrb[10].mxu1  ;;  %v1579_v37 = vld [vmem:[%s2073_s3] sm:$0xff]  }
 0x27c   : > { %v1462_v39 = vpop.f32.mrb[11].mxu1  ;;  %v803_v40 = vsel %vm525_vm2, %v802_v36, -inf  ;;  %1482 = vmatpush3.bf16.msra.mxu1 %v1579_v37  ;;  %v1580_v38 = vld [vmem:[%s2073_s3 + $0x8] sm:$0xff]  }
 0x27d   : > { %804 = vmax.xlane.f32.xlu0 %v803_v40  ;;  %1483 = vmatprep.subr.bf16.mxu1 %v1706_v0 }
 0x280   : > { %1484 = vmatpush3.bf16.msra.mxu1 %v1580_v38 }
 0x281   : > { %v913_v41 = vpop.f32.mrb[12].mxu1  ;;  %1497 = vmatprep.subr.bf16.mxu1 %v1706_v0 }
 0x282   : > { %v919_v42 = vmul.f32 0.35355338, %v913_v41  ;;  %v1473_v43 = vpop.f32.mrb[13].mxu1 }
 0x283   : > { %v916_v44 = vpop.f32.mrb[14].mxu1 }
 0x284   : > { %v1474_v45 = vpop.f32.mrb[15].mxu1  ;;  %v920_v46 = vsel %vm525_vm2, %v919_v42, -inf }
 0x285   : > { %921 = vmax.xlane.f32.xlu1 %v920_v46 }
 0x2fa   : > { %v575_v47 = vpop.xlane.xlu1 %574 }
 0x2fb   : > { %v576_v48 = vsub.f32 %v572_v24, %v575_v47 }
 0x2fd   : > { %v577_v49 = vmul.f32 1.442695, %v576_v48 }
 0x2ff   : > { %1587 = vpow2.f32 %v577_v49 }
 0x302   : > { %v688_v50 = vpop.xlane.xlu0 %687 }
 0x303   : > { %v689_v51 = vsub.f32 %v685_v30, %v688_v50 }
 0x305   : > { %v690_v52 = vmul.f32 1.442695, %v689_v51 }
 0x307   : > { %1589 = vpow2.f32 %v690_v52  ;;  %v1373_v52 = vld [vmem:[%s2074_s4] ss:$0 sm:$0xff] }
 0x309   : > { %v1588_v53 = vpop.eup %1587 }
 0x30a   : > { %v805_v54 = vpop.xlane.xlu0 %804  ;;  %v579_v55 = vsel %vm525_vm2, %v1588_v53, 0.0 }
 0x30b   : > { %v806_v56 = vsub.f32 %v802_v36, %v805_v54  ;;  %580 = vadd.xlane.f32.xlu0 %v579_v55 }
 0x30d   : > { %v807_v57 = vmul.f32 1.442695, %v806_v56 }
 0x30f   : > { %1591 = vpow2.f32 %v807_v57 }
 0x311   : > { %v1590_v58 = vpop.eup %1589 }
 0x312   : > { %v692_v59 = vsel %vm525_vm2, %v1590_v58, 0.0  ;;  %v922_v62 = vpop.xlane.xlu1 %921 }
 0x313   : > { %693 = vadd.xlane.f32.xlu1 %v692_v59  ;;  %v923_v63 = vsub.f32 %v919_v42, %v922_v62 }
 0x315   : > { %v924_v1 = vmul.f32 1.442695, %v923_v63 }
 0x317   : > { %1593 = vpow2.f32 %v924_v1 }
 0x319   : > { %v1592_v60 = vpop.eup %1591 }
 0x31a   : > { %v809_v61 = vsel %vm525_vm2, %v1592_v60, 0.0 }
 0x31b   : > { %810 = vadd.xlane.f32.xlu0 %v809_v61 }
 0x321   : > { %v1594_v2 = vpop.eup %1593 }
 0x322   : > { %v926_v4 = vsel %vm525_vm2, %v1594_v2, 0.0 }
 0x324   : > { %698 = vrot.lane.b32.xlu1 %v1905_v10, %s1715_s17 }
 0x331   : > { %585 = vrot.lane.b32.xlu0 %v1905_v10, %s1716_s24 }
 0x335   : > { %932 = vrot.lane.b32.xlu0 %v1905_v10, %s1717_s30  ;;  %s1392_s30 = sshll.u32 %s1814_s29, 7  ;;  %s1722_s29 = smov [#allocation6]  }
 0x336   : > { %s2027_s0 = scalar_lea.hbm %s2083_s13, %s1392_s30 }
 0x348   : > { %927 = vadd.xlane.f32.xlu1 %v926_v4  ;;  %v1582_v4 = vld [vmem:[#allocation3 + $0x8] sm:$0xff]  }
 0x359   : > { %815 = vrot.lane.b32.xlu1 %v1905_v10, %s1718_s16  ;;  %s446_s16 = scalar_lea.vmem [#allocation6], %s1359_s23  ;;  %s1639_s23 = sshll.u32 %s1722_s29, 4  ;;  %s1640_s23 = int_to_ptr.vmem [resolvable:$false] %s1639_s23 }
 0x35a   : > { %s1641_s17 = scalar_lea.vmem %s1640_s23, 256 }
 0x398   : > { %v581_v5 = vpop.xlane.xlu0 %580 }
 0x399   : > { %1595 = vrcp.f32 %v581_v5  ;;  %v1584_v5 = vld [vmem:[%s2077_s7 + $0x8] sm:$0xff]  }
 0x3a0   : > { %v694_v6 = vpop.xlane.xlu1 %693 }
 0x3a1   : > { %1597 = vrcp.f32 %v694_v6 }
 0x3a3   : > { %v1596_v7 = vpop.eup %1595 }
 0x3a4   : > { %v583_v9 = vmul.f32 %v1596_v7, %v1588_v53  ;;  %v699_v13 = vpop.permute.xlu1 %698 }
 0x3a5   : > { %v704_v16 = vsel %vm590_vm3, %v699_v13, 0  ;;  %v1378_v13 = vld [vmem:[%s2080_s10] ss:$0 sm:$0xff] }
 0x3a6   : > { %v584_v14 = vpack.c.bf16 %v583_v9, %v583_v9 }
 0x3a8   : > { %v811_v8 = vpop.xlane.xlu0 %810 }
 0x3a9   : > { %1599 = vrcp.f32 %v811_v8 }
 0x3ab   : > { %v1598_v15 = vpop.eup %1597 }
 0x3ac   : > { %v586_v11 = vpop.permute.xlu0 %585  ;;  %v696_v10 = vmul.f32 %v1598_v15, %v1590_v58 }
 0x3ad   : > { %v592_v12 = vsel %vm590_vm3, %v586_v11, 0  ;;  %v1377_v11 = vld [vmem:[%s2079_s9] ss:$0 sm:$0xff] }
 0x3ae   : > { %1440 = vmatpush3.bf16.msra.mxu0 %v592_v12  ;;  %v697_v17 = vpack.c.bf16 %v696_v10, %v696_v10  ;;  %v1585_v10 = vld [vmem:[%s2077_s7 + $0x10] sm:$0xff]  }
 0x3af   : > { %1451 = vmatprep.subr.bf16.mxu0 %v1706_v0 }
 0x3b0   : > { %v933_v23 = vpop.permute.xlu0 %932 }
 0x3b1   : > { %1442 = vmatmul.mubr.msk.bf16.vlgmr.msra.gmra.mrb[4].mxu0 %vm525_vm2, %v584_v14  ;;  %v938_v25 = vsel %vm590_vm3, %v933_v23, 0 }
 0x3b2   : > { %1452 = vmatpush3.bf16.msra.mxu0 %v704_v16  ;;  %1453 = vmatprep.mubr.msk.bf16.mxu0 %vm1707_vm0, %v1706_v0 }
 0x3b3   : > { %1463 = vmatprep.subr.bf16.mxu0 %v1706_v0  ;;  %v1600_v18 = vpop.eup %1599 }
 0x3b4   : > { %v813_v20 = vmul.f32 %v1600_v18, %v1592_v60  ;;  %v1379_v18 = vld [vmem:[%s2076_s6] ss:$0 sm:$0xff] }
 0x3b6   : > { %v814_v24 = vpack.c.bf16 %v813_v20, %v813_v20 }
 0x3b9   : > { %1454 = vmatmul.mubr.msk.bf16.vlgmr.msra.gmra.mrb[8].mxu0 %vm525_vm2, %v697_v17  ;;  %v1586_v17 = vld [vmem:[%s2077_s7 + $0x18] sm:$0xff]  }
 0x3ba   : > { %1465 = vmatprep.mubr.msk.bf16.mxu0 %vm1707_vm0, %v1706_v0 }
 0x3d5   : > { %v928_v19 = vpop.xlane.xlu1 %927 }
 0x3d6   : > { %1601 = vrcp.f32 %v928_v19 }
 0x3d9   : > { %v816_v21 = vpop.permute.xlu1 %815 }
 0x3da   : > { %v821_v22 = vsel %vm590_vm3, %v816_v21, 0 }
 0x3db   : > { %1464 = vmatpush3.bf16.msra.mxu0 %v821_v22 }
 0x3dc   : > { %1475 = vmatprep.subr.bf16.mxu0 %v1706_v0 }
 0x3de   : > { %1466 = vmatmul.mubr.msk.bf16.vlgmr.msra.gmra.mrb[12].mxu0 %vm525_vm2, %v814_v24 }
 0x3df   : > { %1476 = vmatpush3.bf16.msra.mxu0 %v938_v25  ;;  %1477 = vmatprep.mubr.msk.bf16.mxu0 %vm1707_vm0, %v1706_v0 }
 0x3e0   : > { %v1602_v26 = vpop.eup %1601  ;;  %1489 = vmatprep.subr.bf16.mxu0 %v1706_v0 }
 0x3e1   : > { %v930_v27 = vmul.f32 %v1602_v26, %v1594_v2  ;;  %v1581_v2 = vld [vmem:[#allocation3] sm:$0xff]  }
 0x3e3   : > { %v931_v28 = vpack.c.bf16 %v930_v27, %v930_v27 }
 0x3e6   : > { %1478 = vmatmul.mubr.msk.bf16.vlgmr.msra.gmra.mrb[16].mxu0 %vm525_vm2, %v931_v28 }
 0x3e7   : > { %1493 = vmatprep.mubr.msk.bf16.mxu0 %vm1707_vm0, %v1706_v0  ;;  %1490 = vmatpush3.bf16.msra.mxu0 %v1581_v2 }
 0x3e8   : > { %1491 = vmatprep.subr.bf16.mxu0 %v1706_v0 }
 0x3eb   : > { %1492 = vmatpush3.bf16.msra.mxu0 %v1582_v4 }
 0x484   : > { %v628_v29 = vpop.f32.mrb[4].mxu0 }
 0x485   : > { %634 = vst.msk [vmem:[#allocation2] sm:$0xff] %vm525_vm2, %v628_v29  ;;  %v1443_v30 = vpop.f32.mrb[5].mxu0 }
 0x486   : > { %v631_v31 = vpop.f32.mrb[6].mxu0 }
 0x487   : > { %v1444_v32 = vpop.f32.mrb[7].mxu0 }
 0x48c   : > { %v740_v33 = vpop.f32.mrb[8].mxu0 }
 0x48d   : > { %747 = vrot.lane.b32.xlu1 %v740_v33, %s1719_s27  ;;  %v1455_v34 = vpop.f32.mrb[9].mxu0  ;;  %s1282_s27 = sshll.u32 %s446_s16, 4  ;;  %s2029_s27 = int_to_ptr.vmem [resolvable:$true] %s1282_s27 }
 0x48e   : > { %v743_v35 = vpop.f32.mrb[10].mxu0  ;;  %p1642_p2 = scmp.lt.s32.totalorder %s2029_s27, %s1640_s23 }
 0x48f   : > { %v1456_v36 = vpop.f32.mrb[11].mxu0 }
 0x4b1   : > { %v857_v39 = vpop.f32.mrb[12].mxu0 }
 0x4b2   : > { %864 = vrot.lane.b32.xlu0 %v857_v39, %s1720_s15  ;;  %v1467_v40 = vpop.f32.mrb[13].mxu0  ;;  %s1269_s15 = scalar_lea.sflag [#allocation5], %s444_s22 }
 0x4b3   : > { %v860_v41 = vpop.f32.mrb[14].mxu0 }
 0x4b4   : > { %v1468_v42 = vpop.f32.mrb[15].mxu0 }
 0x4b5   : > { %v1389_v42 = vld [vmem:[%s2081_s11] ss:$0 sm:$0xff] }
 0x4b9   : > { %v974_v43 = vpop.f32.mrb[16].mxu0 }
 0x4ba   : > { %981 = vrot.lane.b32.xlu1 %v974_v43, %s1721_s21  ;;  %v1479_v44 = vpop.f32.mrb[17].mxu0  ;;  %s1635_s21 = scalar_lea.vmem %s2029_s27, 128 }
 0x4bb   : > { %v977_v45 = vpop.f32.mrb[18].mxu0  ;;  %v1390_v44 = vld [vmem:[%s2082_s12] ss:$0 sm:$0xff]  ;;  %p1636_p6 = scmp.ne.s32.totalorder %s2029_s27, %s1635_s21  ;;  %p1643_p3 = scmp.lt.s32.totalorder %s1641_s17, %s1635_s21 }
 0x4bc   : > { %v1480_v46 = vpop.f32.mrb[19].mxu0 }
 0x4bd   : > { %p1637_p10 = pnand %p1636_p6, %p2102_p9  ;;  %p1644_p4 = por %p1643_p3, %p1642_p2 }
 0x4bf   : > { %p1638_p12 = pneg %p1637_p10 }
 0x4c1   : > { %p1645_p7 = pnand %p1644_p4, %p1638_p12 }
 0x4ff   : > { %v748_v47 = vpop.permute.xlu1 %747 }
 0x500   : > { %751 = vst.msk [vmem:[#allocation2] sm:$0xff] %vm750_vm4, %v748_v47 }
 0x524   : > { %v865_v48 = vpop.permute.xlu0 %864 }
 0x525   : > { %868 = vst.msk [vmem:[#allocation2] sm:$0xff] %vm867_vm5, %v865_v48 }
 0x52c   : > { %v982_v49 = vpop.permute.xlu1 %981 }
 0x52d   : > { %985 = vst.msk [vmem:[#allocation2] sm:$0xff] %vm984_vm6, %v982_v49 }
 0x534   : > { %v986_v50 = vld [vmem:[#allocation2] sm:$0xff] }
 0x535   : > { %v987_v51 = vpack.c.bf16 %v986_v50, %v986_v50 }
 0x537   : > { %1486 = vmatmul.mubr.msk.bf16.vlgmr.msra.gmra.mrb[16].mxu1 %vm477_vm1, %v987_v51 }
 0x538   : > { %1505 = vmatprep.mubr.msk.bf16.mxu1 %vm1707_vm0, %v1706_v0 }
 0x60a   : > { %v1048_v53 = vpop.f32.mrb[16].mxu1 }
 0x60b   : > { %v1049_v54 = vadd.f32 %v1373_v52, %v1048_v53  ;;  %v1487_v55 = vpop.f32.mrb[17].mxu1 }
 0x60c   : > { %v1051_v56 = vpop.f32.mrb[18].mxu1 }
 0x60d   : > { %v1488_v57 = vpop.f32.mrb[19].mxu1  ;;  %v1054_v58 = vadd.f32 %v1049_v54, %v1893_v3  ;;  %v1583_v3 = vld [vmem:[%s2077_s7] sm:$0xff]  }
 0x60e   : > { %1498 = vmatpush3.bf16.msra.mxu1 %v1583_v3 }
 0x60f   : > { %v1057_v59 = vsel %vm477_vm1, %v1054_v58, 0.0  ;;  %1499 = vmatprep.subr.bf16.mxu1 %v1706_v0 }
 0x610   : > { %1058 = vadd.xlane.f32.xlu0 %v1057_v59 }
 0x612   : > { %1500 = vmatpush3.bf16.msra.mxu1 %v1584_v5 }
 0x613   : > { %1501 = vmatprep.subr.bf16.mxu1 %v1706_v0 }
 0x616   : > { %1502 = vmatpush3.bf16.msra.mxu1 %v1585_v10 }
 0x617   : > { %1503 = vmatprep.subr.bf16.mxu1 %v1706_v0  ;;  %v1383_v0 = vld [vmem:[%s2078_s8] ss:$0 sm:$0xff] }
 0x61a   : > { %1504 = vmatpush3.bf16.msra.mxu1 %v1586_v17 }
 0x69d   : > { %v1059_v60 = vpop.xlane.xlu0 %1058 }
 0x69e   : > { %v1061_v61 = vmul.f32 0.03125, %v1059_v60 }
 0x6a0   : > { %v1062_v62 = vsub.f32 %v1054_v58, %v1061_v61 }
 0x6a2   : > { %v1063_v63 = vmul.f32 %v1062_v62, %v1062_v62 }
 0x6a4   : > { %v1064_v1 = vsel %vm477_vm1, %v1063_v63, 0.0 }
 0x6a5   : > { %1065 = vadd.xlane.f32.xlu1 %v1064_v1 }
 0x732   : > { %v1066_v6 = vpop.xlane.xlu1 %1065 }
 0x733   : > { %v1067_v7 = vmul.f32 0.03125, %v1066_v6 }
 0x735   : > { %v1068_v8 = vadd.f32 1e-05, %v1067_v7 }
 0x737   : > { %1603 = vrsqrt.f32 %v1068_v8 }
 0x741   : > { %v1604_v9 = vpop.eup %1603 }
 0x742   : > { %v1070_v12 = vmul.f32 %v1604_v9, %v1062_v62 }
 0x744   : > { %v1077_v14 = vmul.f32 %v1377_v11, %v1070_v12 }
 0x746   : > { %v1084_v15 = vadd.f32 %v1378_v13, %v1077_v14 }
 0x748   : > { %v1085_v16 = vpack.c.bf16 %v1084_v15, %v1084_v15 }
 0x74a   : > { %1494 = vmatmul.mubr.msk.bf16.vlgmr.msra.gmra.mrb[20].mxu0 %vm477_vm1, %v1085_v16 }
 0x81d   : > { %v1146_v19 = vpop.f32.mrb[20].mxu0 }
 0x81e   : > { %v1147_v20 = vadd.f32 %v1379_v18, %v1146_v19  ;;  %v1495_v21 = vpop.f32.mrb[21].mxu0 }
 0x81f   : > { %v1149_v22 = vpop.f32.mrb[22].mxu0 }
 0x820   : > { %v1152_v23 = vmax.f32 %v1147_v20, 0.0  ;;  %v1496_v24 = vpop.f32.mrb[23].mxu0 }
 0x822   : > { %v1153_v25 = vpack.c.bf16 %v1152_v23, %v1152_v23 }
 0x824   : > { %1506 = vmatmul.mubr.msk.bf16.vlgmr.msra.gmra.mrb[20].mxu1 %vm1193_vm7, %v1153_v25 }
 0x8f7   : > { %v1231_v26 = vpop.f32.mrb[20].mxu1 }
 0x8f8   : > { %v1232_v27 = vadd.f32 %v1383_v0, %v1231_v26  ;;  %v1507_v28 = vpop.f32.mrb[21].mxu1 }
 0x8f9   : > { %v1234_v29 = vpop.f32.mrb[22].mxu1 }
 0x8fa   : > { %v1508_v30 = vpop.f32.mrb[23].mxu1  ;;  %v1237_v31 = vadd.f32 %v1232_v27, %v1084_v15 }
 0x8fc   : > { %v1240_v32 = vsel %vm477_vm1, %v1237_v31, 0.0 }
 0x8fd   : > { %1241 = vadd.xlane.f32.xlu0 %v1240_v32 }
 0x98a   : > { %v1242_v33 = vpop.xlane.xlu0 %1241 }
 0x98b   : > { %v1243_v34 = vmul.f32 0.03125, %v1242_v33 }
 0x98d   : > { %v1244_v35 = vsub.f32 %v1237_v31, %v1243_v34 }
 0x98f   : > { %v1245_v36 = vmul.f32 %v1244_v35, %v1244_v35 }
 0x991   : > { %v1246_v37 = vsel %vm477_vm1, %v1245_v36, 0.0 }
 0x992   : > { %1247 = vadd.xlane.f32.xlu0 %v1246_v37 }
 0xa1f   : > { %v1248_v38 = vpop.xlane.xlu0 %1247 }
 0xa20   : > { %v1249_v39 = vmul.f32 0.03125, %v1248_v38 }
 0xa22   : > { %v1250_v40 = vadd.f32 1e-05, %v1249_v39 }
 0xa24   : > { %1605 = vrsqrt.f32 %v1250_v40 }
 0xa2e   : > { %v1606_v41 = vpop.eup %1605 }
 0xa2f   : > { %v1252_v43 = vmul.f32 %v1606_v41, %v1244_v35 }
 0xa31   : > { %v1259_v45 = vmul.f32 %v1389_v42, %v1252_v43 }
 0xa33   : > { %v1266_v46 = vadd.f32 %v1390_v44, %v1259_v45 }
 0xa35   : > { %1267 = vst.msk [vmem:[%s446_s16] sm:$0xff] %vm477_vm1, %v1266_v46 }
 0xa36   : > { %1648 = shalt.err (!%p1645_p7)
}
 0xa37   : > { %s1649_s22 = scalar_lea.hbm %s2027_s0, 128  ;;  %s1653_s16 = scalar_lea.hbm %s2083_s13, 256 }
 0xa38   : > { %p1650_p8 = scmp.ne.s32.totalorder %s2027_s0, %s1649_s22  ;;  %p1654_p1 = scmp.lt.u32.totalorder %s2027_s0, %s2083_s13 }
 0xa39   : > { %p1655_p0 = scmp.lt.u32.totalorder %s1653_s16, %s1649_s22  ;;  %p1657_p6 = scmp.lt.u32.totalorder %s1649_s22, %s2027_s0 }
 0xa3a   : > { %p1651_p11 = pnand %p1650_p8, %p2102_p9 }
 0xa3b   : > { %p1656_p5 = por %p1655_p0, %p1654_p1 }
 0xa3c   : > { %p1652_p13 = pneg %p1651_p11 }
 0xa3d   : > { %p1658_p10 = por %p1657_p6, %p1656_p5 }
 0xa3f   : > { %p1659_p12 = pnand %p1658_p10, %p1652_p13 }
 0xa41   : > { %1662 = shalt.err (!%p1659_p12)
}
 0xa42   : > { %1513 = dma.vmem_to_hbm [thread:$0]  (%p2102_p9), %s2029_s27, 128, %s2027_s0, %s1269_s15  }
 0xa43 PF: > { %p1525_p2 = scmp.ge.s32.totalorder %s1701_s28, 2  ;;  %s1294_s21 = sand.u32 1, %s1689_s25  }
 0xa44   : > { %p2103_p3 = scmp.ne.s32.totalorder %s2095_s19, 0  ;;  %s1295_s29 = scalar_lea.sflag [#allocation5], %s1294_s21 }
 0xa46   : > { %p1520_p4 = pnand %p1525_p2, %p2103_p3 }
 0xa48   : > { %1684 = dma.done.wait (!%p1520_p4), %s1295_s29, 128  }
 0xa49   : > { %1686 = vsyncadd (!%p1520_p4), %s1295_s29, 4294967168  ;;  %s2104_s28 = sld [smem:[#allocation10_spill]]  ;;  %s2105_s23 = sld [smem:[#allocation9_spill]] }
 0xa4a   : > { %s2106_s27 = sld [smem:[#allocation11_spill]]  ;;  %s2107_s25 = smov %s1693_s26 }
 0xa4f   : > { %p24_p7 = scmp.ge.s32.totalorder %s2104_s28, 4   ;;  %s2108_s26 = smov %s2105_s23 }
 0xa51   :  { %26 = sbr.rel (!%p24_p7) target bundleno = 6 (0x6), region = 112 }
 0xa58   :  { %1300 = vsyncpa [#allocation4], 1 }
 0xa59   :  { %1302 = vsyncpa [#allocation4 + $0x1], 1 }
 0xa5a   :  { %1303 = vsyncpa [#allocation5], 1 }
 0xa5b   :  { %1305 = vsyncpa [#allocation5 + $0x1], 1 }

// kernel: tpu_custom_call.1
= control target key start
LH: loop header
LB: loop body
LE: loop exit
PB: predicated region body
PF: predicated region fallthrough
CT: control target
= control target key end

     0   :  { %s2070_s0 = inlined_call_operand.vmem [shape: f32[2,8,32], index: 0, kind: input, shape index: {}]   ;;  %s2071_s1 = inlined_call_operand.vmem [shape: bf16[32,96], index: 1, kind: input, shape index: {}]   ;;  %s2072_s2 = inlined_call_operand.vmem [shape: f32[1,96], index: 2, kind: input, shape index: {}]   ;;  %s2073_s3 = inlined_call_operand.vmem [shape: bf16[32,32], index: 3, kind: input, shape index: {}]   ;;  %s2074_s4 = inlined_call_operand.vmem [shape: f32[1,32], index: 4, kind: input, shape index: {}]   ;;  %s2075_s5 = inlined_call_operand.hbm [shape: bf16[32,64], index: 5, kind: input, shape index: {}]   ;;  %s2076_s6 = inlined_call_operand.vmem [shape: f32[1,64], index: 6, kind: input, shape index: {}]   ;;  %s2077_s7 = inlined_call_operand.vmem [shape: bf16[64,32], index: 7, kind: input, shape index: {}]   ;;  %s2078_s8 = inlined_call_operand.vmem [shape: f32[1,32], index: 8, kind: input, shape index: {}]   ;;  %s2079_s9 = inlined_call_operand.vmem [shape: f32[1,32], index: 9, kind: input, shape index: {}]   ;;  %s2080_s10 = inlined_call_operand.vmem [shape: f32[1,32], index: 10, kind: input, shape index: {}]   ;;  %s2081_s11 = inlined_call_operand.vmem [shape: f32[1,32], index: 11, kind: input, shape index: {}]   ;;  %s2082_s12 = inlined_call_operand.vmem [shape: f32[1,32], index: 12, kind: input, shape index: {}]   ;;  %s2083_s13 = inlined_call_operand.hbm [shape: f32[2,8,32], index: 13, kind: output, shape index: {}]  }
   0x1   :  { %2090 = sst [smem:[#allocation12_spill]] %s2070_s0 }
   0x2   :  { %18 = vsyncpa [#allocation4], 0 }
   0x3   :  { %19 = vsyncpa [#allocation5], 0 }
   0x4   :  { %21 = vsyncpa [#allocation5 + $0x1], 0  ;;  %s1793_s25 = smov 0   ;;  %s1795_s26 = smov 0  }
   0x5   :  { %s1797_s27 = smov 0   ;;  %s1799_s28 = smov 0  }
   0x6 LB: > { %2091 = sst [smem:[#allocation9_spill]] %s1697_s27  ;;  %s1814_s29 = sadd.s32 4294967295, %s1701_s28   ;;  %s1701_s28 = sphi %s1799_s28, %s2104_s28   ;;  %s1697_s27 = sphi %s1797_s27, %s2106_s27   ;;  %s1693_s26 = sphi %s1795_s26, %s2108_s26   ;;  %s1689_s25 = sphi %s1793_s25, %s2107_s25  }
   0x7   : > { %s1353_s30 = sadd.s32 4294967294, %s1701_s28   ;;  %s1818_s14 = sadd.s32 1, %s1701_s28  }
   0x8   : > { %2092 = sst [smem:[#allocation10_spill]] %s1818_s14  ;;  %s312_s15 = sadd.s32 1, %s1697_s27 }
   0x9   : > { %s309_s16 = ssub.s32 %s1701_s28, %s1818_s14  ;;  %p322_p0 = scmp.ne.s32.totalorder %s1697_s27, %s1693_s26 }
   0xa   : > { %p310_p1 = scmp.eq.s32.totalorder %s309_s16, 0  ;;  %p323_p2 = scmp.eq.s32.totalorder %s1814_s29, 1 }
   0xb   : > { %p328_p3 = scmp.ne.s32.totalorder %s1693_s26, %s1689_s25  ;;  %p329_p4 = scmp.eq.s32.totalorder %s1353_s30, 1 }
   0xc   : > { %s1829_s17 = scalar_select %p310_p1, %s1697_s27, %s312_s15  }
   0xd   : > { %p1831_p5 = por %p323_p2, %p322_p0  ;;  %p1835_p6 = por %p329_p4, %p328_p3 }
   0xe   : > { %2093 = sst [smem:[#allocation11_spill]] %s1829_s17  ;;  %p1354_p7 = scmp.ge.s32.totalorder %s1701_s28, 1 }
   0xf   : > { %s2094_s18 = scalar_select %p1831_p5, 1, 0 }
  0x10   : > { %s2095_s19 = scalar_select %p1835_p6, 1, 0 }
  0x11   : > { %p336_p8 = scmp.lt.s32.totalorder %s1701_s28, 3  ;;  %p2087_p9 = scmp.eq.s32.totalorder %s1814_s29, 0 }
  0x12   : > { %s1703_s21 = smov [#allocation3]   ;;  %s1607_s15 = scalar_lea.hbm %s2075_s5, 256 }
  0x13   : > { %p1842_p10 = pnand %p1354_p7, %p336_p8  ;;  %s360_s22 = sshll.u32 %s1703_s21, 4  ;;  %s361_s22 = int_to_ptr.vmem [resolvable:$true] %s360_s22 }
  0x14   : > { %p1608_p13 = scmp.ne.s32.totalorder %s2075_s5, %s1607_s15  ;;  %p1614_p3 = scmp.lt.u32.totalorder %s1607_s15, %s2075_s5 }
  0x15   : > { %s2096_s20 = scalar_select %p1842_p10, 1, 0 }
  0x16   : > { %p1515_p11 = pneg %p1842_p10 }
  0x18   : > { %p1850_p12 = pnand %p2087_p9, %p1515_p11 }
  0x1a   : > { %p1609_p0 = pneg %p1850_p12 }
  0x1c   : > { %p1610_p1 = pnand %p1609_p0, %p1608_p13 }
  0x1e   : > { %p1611_p2 = pneg %p1610_p1 }
  0x20   : > { %p1616_p4 = pnand %p1614_p3, %p1611_p2 }
  0x22   : > { %1619 = shalt.err (!%p1616_p4)
}
  0x23   : > { %s1620_s14 = scalar_lea.vmem %s361_s22, 256  ;;  %p1628_p9 = scmp.lt.s32.totalorder %s361_s22, %s361_s22 }
  0x24   : > { %p1621_p7 = scmp.ne.s32.totalorder %s361_s22, %s1620_s14  ;;  %p1629_p6 = scmp.lt.s32.totalorder %s1620_s14, %s1620_s14 }
  0x26   : > { %p1623_p8 = pnand %p1621_p7, %p1609_p0  ;;  %p1630_p5 = por %p1629_p6, %p1628_p9 }
  0x28   : > { %p1624_p11 = pneg %p1623_p8 }
  0x2a   : > { %p1631_p10 = pnand %p1630_p5, %p1624_p11 }
  0x2c   : > { %1634 = shalt.err (!%p1631_p10)
}
  0x2d   : > { %s1704_s17 = smov 64   ;;  %s1705_s24 = smov 4  }
  0x2e   : > { %1518 = dma.hbm_to_vmem [thread:$0]  (!%p1850_p12), %s2075_s5, 256, %s361_s22, [#allocation4], %s1704_s17, %s1704_s17, %s1705_s24  }
  0x2f   : > { %p2098_p13 = scmp.ne.s32.totalorder %s2096_s20, 0 }
  0x30   : > { %p2099_p1 = scmp.eq.s32.totalorder (!%p2098_p13), %s1814_s29, 0 }
  0x31   : > { %404 = sbr.rel (%p2098_p13) target bundleno = 2627 (0xa43), region = 72 }
  0x38   : > { %1680 = dma.done.wait (%p2099_p1), [#allocation4], 256   ;;  %p2100_p0 = pmov %p2099_p1 }
  0x39   : > { %p447_p5 = scmp.lt.s32.totalorder %s1814_s29, 1  ;;  %v1706_v0 = vmov 0.0   ;;  %vm1707_vm0 = vmmov 0   ;;  %s2101_s0 = sld [smem:[#allocation12_spill]]  ;;  %v1577_v1 = vld [vmem:[%s2071_s1] sm:$0xff]   ;;  %v1578_v2 = vld [vmem:[%s2071_s1 + $0x8] sm:$0xff]  }
  0x3a   : > { %1682 = vsyncadd (%p2100_p0), [#allocation4], 4294967040  ;;  %1425 = vmatprep.subr.bf16.mxu0 %v1706_v0  ;;  %1429 = vmatprep.mubr.msk.bf16.mxu0 %vm1707_vm0, %v1706_v0  ;;  %vm477_vm1 = vcmask 261120   ;;  %v1361_v5 = vld [vmem:[%s2072_s2] ss:$0 sm:$0xff]  ;;  %s1710_s20 = smov 80  }
  0x3b   : > { %s448_s27 = scalar_select %p447_p5, %s1814_s29, 1  ;;  %1433 = vmatprep.subr.bf16.mxu1 %v1706_v0  ;;  %1435 = vmatprep.mubr.msk.bf16.mxu1 %vm1707_vm0, %v1706_v0  ;;  %vm525_vm2 = vcmask 64512   ;;  %vm590_vm3 = vcmask 1043456   ;;  %vm750_vm4 = vcmask 130112   ;;  %vm867_vm5 = vcmask 195712  }
  0x3c   : > { %1426 = vmatpush3.bf16.msra.mxu0 %v1577_v1  ;;  %s1711_s22 = smov 88   ;;  %s1713_s15 = smov 112   ;;  %vm984_vm6 = vcmask 261312   ;;  %vm1193_vm7 = vcmask 523264  }
  0x3d   : > { %s1360_s14 = sshll.u32 %s448_s27, 3  ;;  %1427 = vmatprep.subr.bf16.mxu0 %v1706_v0  ;;  %s1708_s27 = smov 120  }
  0x3e   : > { %s1714_s21 = smov 104   ;;  %s1715_s17 = smov 56  }
  0x3f   : > { %s450_s23 = scalar_lea.vmem %s2101_s0, %s1360_s14  ;;  %s1709_s14 = smov 96  }
  0x40   : > { %v1893_v3 = vld [vmem:[%s450_s23] sm:$0xff]  ;;  %1428 = vmatpush3.bf16.msra.mxu0 %v1578_v2  ;;  %s1712_s23 = smov 72   ;;  %s1716_s24 = smov 64  }
  0x41   : > { %v453_v4 = vpack.c.bf16 %v1893_v3, %v1893_v3  ;;  %1439 = vmatprep.subr.bf16.mxu0 %v1706_v0  ;;  %s1717_s30 = smov 40   ;;  %s1718_s16 = smov 48  }
  0x42   : > { %p2102_p9 = scmp.ne.s32.totalorder %s2094_s18, 0 }
  0x43   : > { %1430 = vmatmul.mubr.msk.bf16.vlgmr.msra.gmra.mrb[0].mxu0 %vm477_vm1, %v453_v4 }
  0x44   : > { %1441 = vmatprep.mubr.msk.bf16.mxu0 %vm1707_vm0, %v1706_v0 }
 0x116   : > { %v515_v6 = vpop.f32.mrb[0].mxu0 }
 0x117   : > { %v516_v7 = vadd.f32 %v1361_v5, %v515_v6  ;;  %v1431_v8 = vpop.f32.mrb[1].mxu0 }
 0x118   : > { %v518_v9 = vpop.f32.mrb[2].mxu0 }
 0x119   : > { %v1905_v10 = vpack.c.bf16 %v516_v7, %v516_v7  ;;  %v1432_v11 = vpop.f32.mrb[3].mxu0 }
 0x11b   : > { %635 = vrot.lane.b32.xlu1 %v1905_v10, %s1708_s27  ;;  %523 = vrot.lane.b32.xlu0 %v1905_v10, %s1709_s14  ;;  %s1719_s27 = smov 8  }
 0x11f   : > { %754 = vrot.lane.b32.xlu1 %v1905_v10, %s1710_s20  ;;  %637 = vrot.lane.b32.xlu0 %v1905_v10, %s1711_s22  ;;  %s444_s22 = sand.u32 1, %s1693_s26  }
 0x123   : > { %871 = vrot.lane.b32.xlu1 %v1905_v10, %s1712_s23  ;;  %752 = vrot.lane.b32.xlu0 %v1905_v10, %s1713_s15  ;;  %s1720_s15 = smov 16   ;;  %s1359_s23 = sshll.u32 %s444_s22, 3 }
 0x127   : > { %869 = vrot.lane.b32.xlu0 %v1905_v10, %s1714_s21  ;;  %s1721_s21 = smov 24  }
 0x18d   : > { %v524_v12 = vpop.permute.xlu0 %523  ;;  %v636_v15 = vpop.permute.xlu1 %635 }
 0x18e   : > { %v530_v13 = vsel %vm525_vm2, %v524_v12, 0 }
 0x18f   : > { %1434 = vmatpush3.bf16.xpose.msra.mxu1 %v530_v13 }
 0x190   : > { %1445 = vmatprep.subr.bf16.mxu1 %v1706_v0 }
 0x191   : > { %v638_v14 = vpop.permute.xlu0 %637  ;;  %v755_v17 = vpop.permute.xlu1 %754 }
 0x192   : > { %v643_v16 = vsel %vm525_vm2, %v638_v14, 0  ;;  %v760_v18 = vsel %vm525_vm2, %v755_v17, 0 }
 0x195   : > { %v872_v19 = vpop.permute.xlu1 %871  ;;  %v753_v20 = vpop.permute.xlu0 %752 }
 0x196   : > { %1436 = vmatmul.mubr.msk.bf16.vlgmr.msra.gmra.mrb[0].mxu1 %vm525_vm2, %v1905_v10  ;;  %v877_v21 = vsel %vm525_vm2, %v872_v19, 0 }
 0x197   : > { %1446 = vmatpush3.bf16.xpose.msra.mxu1 %v643_v16  ;;  %1447 = vmatprep.mubr.msk.bf16.mxu1 %vm1707_vm0, %v1706_v0 }
 0x198   : > { %1457 = vmatprep.subr.bf16.mxu1 %v1706_v0 }
 0x199   : > { %v870_v22 = vpop.permute.xlu0 %869 }
 0x19e   : > { %1448 = vmatmul.mubr.msk.bf16.vlgmr.msra.gmra.mrb[4].mxu1 %vm525_vm2, %v636_v15 }
 0x19f   : > { %1458 = vmatpush3.bf16.xpose.msra.mxu1 %v760_v18  ;;  %1459 = vmatprep.mubr.msk.bf16.mxu1 %vm1707_vm0, %v1706_v0 }
 0x1a0   : > { %1469 = vmatprep.subr.bf16.mxu1 %v1706_v0 }
 0x1a6   : > { %1460 = vmatmul.mubr.msk.bf16.vlgmr.msra.gmra.mrb[8].mxu1 %vm525_vm2, %v753_v20 }
 0x1a7   : > { %1470 = vmatpush3.bf16.xpose.msra.mxu1 %v877_v21  ;;  %1471 = vmatprep.mubr.msk.bf16.mxu1 %vm1707_vm0, %v1706_v0 }
 0x1a8   : > { %1481 = vmatprep.subr.bf16.mxu1 %v1706_v0 }
 0x1ae   : > { %1472 = vmatmul.mubr.msk.bf16.vlgmr.msra.gmra.mrb[12].mxu1 %vm525_vm2, %v870_v22 }
 0x1af   : > { %1485 = vmatprep.mubr.msk.bf16.mxu1 %vm1707_vm0, %v1706_v0 }
 0x269   : > { %v566_v23 = vpop.f32.mrb[0].mxu1 }
 0x26a   : > { %v572_v24 = vmul.f32 0.35355338, %v566_v23  ;;  %v1437_v25 = vpop.f32.mrb[1].mxu1 }
 0x26b   : > { %v569_v26 = vpop.f32.mrb[2].mxu1 }
 0x26c   : > { %v1438_v27 = vpop.f32.mrb[3].mxu1  ;;  %v573_v28 = vsel %vm525_vm2, %v572_v24, -inf }
 0x26d   : > { %574 = vmax.xlane.f32.xlu1 %v573_v28 }
 0x271   : > { %v679_v29 = vpop.f32.mrb[4].mxu1 }
 0x272   : > { %v685_v30 = vmul.f32 0.35355338, %v679_v29  ;;  %v1449_v31 = vpop.f32.mrb[5].mxu1 }
 0x273   : > { %v682_v32 = vpop.f32.mrb[6].mxu1 }
 0x274   : > { %v1450_v33 = vpop.f32.mrb[7].mxu1  ;;  %v686_v34 = vsel %vm525_vm2, %v685_v30, -inf }
 0x275   : > { %687 = vmax.xlane.f32.xlu0 %v686_v34 }
 0x279   : > { %v796_v35 = vpop.f32.mrb[8].mxu1 }
 0x27a   : > { %v802_v36 = vmul.f32 0.35355338, %v796_v35  ;;  %v1461_v37 = vpop.f32.mrb[9].mxu1 }
 0x27b   : > { %v799_v38 = vpop.f32.mrb[10].mxu1  ;;  %v1579_v37 = vld [vmem:[%s2073_s3] sm:$0xff]  }
 0x27c   : > { %v1462_v39 = vpop.f32.mrb[11].mxu1  ;;  %v803_v40 = vsel %vm525_vm2, %v802_v36, -inf  ;;  %1482 = vmatpush3.bf16.msra.mxu1 %v1579_v37  ;;  %v1580_v38 = vld [vmem:[%s2073_s3 + $0x8] sm:$0xff]  }
 0x27d   : > { %804 = vmax.xlane.f32.xlu0 %v803_v40  ;;  %1483 = vmatprep.subr.bf16.mxu1 %v1706_v0 }
 0x280   : > { %1484 = vmatpush3.bf16.msra.mxu1 %v1580_v38 }
 0x281   : > { %v913_v41 = vpop.f32.mrb[12].mxu1  ;;  %1497 = vmatprep.subr.bf16.mxu1 %v1706_v0 }
 0x282   : > { %v919_v42 = vmul.f32 0.35355338, %v913_v41  ;;  %v1473_v43 = vpop.f32.mrb[13].mxu1 }
 0x283   : > { %v916_v44 = vpop.f32.mrb[14].mxu1 }
 0x284   : > { %v1474_v45 = vpop.f32.mrb[15].mxu1  ;;  %v920_v46 = vsel %vm525_vm2, %v919_v42, -inf }
 0x285   : > { %921 = vmax.xlane.f32.xlu1 %v920_v46 }
 0x2fa   : > { %v575_v47 = vpop.xlane.xlu1 %574 }
 0x2fb   : > { %v576_v48 = vsub.f32 %v572_v24, %v575_v47 }
 0x2fd   : > { %v577_v49 = vmul.f32 1.442695, %v576_v48 }
 0x2ff   : > { %1587 = vpow2.f32 %v577_v49 }
 0x302   : > { %v688_v50 = vpop.xlane.xlu0 %687 }
 0x303   : > { %v689_v51 = vsub.f32 %v685_v30, %v688_v50 }
 0x305   : > { %v690_v52 = vmul.f32 1.442695, %v689_v51 }
 0x307   : > { %1589 = vpow2.f32 %v690_v52  ;;  %v1373_v52 = vld [vmem:[%s2074_s4] ss:$0 sm:$0xff] }
 0x309   : > { %v1588_v53 = vpop.eup %1587 }
 0x30a   : > { %v805_v54 = vpop.xlane.xlu0 %804  ;;  %v579_v55 = vsel %vm525_vm2, %v1588_v53, 0.0 }
 0x30b   : > { %v806_v56 = vsub.f32 %v802_v36, %v805_v54  ;;  %580 = vadd.xlane.f32.xlu0 %v579_v55 }
 0x30d   : > { %v807_v57 = vmul.f32 1.442695, %v806_v56 }
 0x30f   : > { %1591 = vpow2.f32 %v807_v57 }
 0x311   : > { %v1590_v58 = vpop.eup %1589 }
 0x312   : > { %v692_v59 = vsel %vm525_vm2, %v1590_v58, 0.0  ;;  %v922_v62 = vpop.xlane.xlu1 %921 }
 0x313   : > { %693 = vadd.xlane.f32.xlu1 %v692_v59  ;;  %v923_v63 = vsub.f32 %v919_v42, %v922_v62 }
 0x315   : > { %v924_v1 = vmul.f32 1.442695, %v923_v63 }
 0x317   : > { %1593 = vpow2.f32 %v924_v1 }
 0x319   : > { %v1592_v60 = vpop.eup %1591 }
 0x31a   : > { %v809_v61 = vsel %vm525_vm2, %v1592_v60, 0.0 }
 0x31b   : > { %810 = vadd.xlane.f32.xlu0 %v809_v61 }
 0x321   : > { %v1594_v2 = vpop.eup %1593 }
 0x322   : > { %v926_v4 = vsel %vm525_vm2, %v1594_v2, 0.0 }
 0x324   : > { %698 = vrot.lane.b32.xlu1 %v1905_v10, %s1715_s17 }
 0x331   : > { %585 = vrot.lane.b32.xlu0 %v1905_v10, %s1716_s24 }
 0x335   : > { %932 = vrot.lane.b32.xlu0 %v1905_v10, %s1717_s30  ;;  %s1392_s30 = sshll.u32 %s1814_s29, 7  ;;  %s1722_s29 = smov [#allocation6]  }
 0x336   : > { %s2027_s0 = scalar_lea.hbm %s2083_s13, %s1392_s30 }
 0x348   : > { %927 = vadd.xlane.f32.xlu1 %v926_v4  ;;  %v1582_v4 = vld [vmem:[#allocation3 + $0x8] sm:$0xff]  }
 0x359   : > { %815 = vrot.lane.b32.xlu1 %v1905_v10, %s1718_s16  ;;  %s446_s16 = scalar_lea.vmem [#allocation6], %s1359_s23  ;;  %s1639_s23 = sshll.u32 %s1722_s29, 4  ;;  %s1640_s23 = int_to_ptr.vmem [resolvable:$false] %s1639_s23 }
 0x35a   : > { %s1641_s17 = scalar_lea.vmem %s1640_s23, 256 }
 0x398   : > { %v581_v5 = vpop.xlane.xlu0 %580 }
 0x399   : > { %1595 = vrcp.f32 %v581_v5  ;;  %v1584_v5 = vld [vmem:[%s2077_s7 + $0x8] sm:$0xff]  }
 0x3a0   : > { %v694_v6 = vpop.xlane.xlu1 %693 }
 0x3a1   : > { %1597 = vrcp.f32 %v694_v6 }
 0x3a3   : > { %v1596_v7 = vpop.eup %1595 }
 0x3a4   : > { %v583_v9 = vmul.f32 %v1596_v7, %v1588_v53  ;;  %v699_v13 = vpop.permute.xlu1 %698 }
 0x3a5   : > { %v704_v16 = vsel %vm590_vm3, %v699_v13, 0  ;;  %v1378_v13 = vld [vmem:[%s2080_s10] ss:$0 sm:$0xff] }
 0x3a6   : > { %v584_v14 = vpack.c.bf16 %v583_v9, %v583_v9 }
 0x3a8   : > { %v811_v8 = vpop.xlane.xlu0 %810 }
 0x3a9   : > { %1599 = vrcp.f32 %v811_v8 }
 0x3ab   : > { %v1598_v15 = vpop.eup %1597 }
 0x3ac   : > { %v586_v11 = vpop.permute.xlu0 %585  ;;  %v696_v10 = vmul.f32 %v1598_v15, %v1590_v58 }
 0x3ad   : > { %v592_v12 = vsel %vm590_vm3, %v586_v11, 0  ;;  %v1377_v11 = vld [vmem:[%s2079_s9] ss:$0 sm:$0xff] }
 0x3ae   : > { %1440 = vmatpush3.bf16.msra.mxu0 %v592_v12  ;;  %v697_v17 = vpack.c.bf16 %v696_v10, %v696_v10  ;;  %v1585_v10 = vld [vmem:[%s2077_s7 + $0x10] sm:$0xff]  }
 0x3af   : > { %1451 = vmatprep.subr.bf16.mxu0 %v1706_v0 }
 0x3b0   : > { %v933_v23 = vpop.permute.xlu0 %932 }
 0x3b1   : > { %1442 = vmatmul.mubr.msk.bf16.vlgmr.msra.gmra.mrb[4].mxu0 %vm525_vm2, %v584_v14  ;;  %v938_v25 = vsel %vm590_vm3, %v933_v23, 0 }
 0x3b2   : > { %1452 = vmatpush3.bf16.msra.mxu0 %v704_v16  ;;  %1453 = vmatprep.mubr.msk.bf16.mxu0 %vm1707_vm0, %v1706_v0 }
 0x3b3   : > { %1463 = vmatprep.subr.bf16.mxu0 %v1706_v0  ;;  %v1600_v18 = vpop.eup %1599 }
 0x3b4   : > { %v813_v20 = vmul.f32 %v1600_v18, %v1592_v60  ;;  %v1379_v18 = vld [vmem:[%s2076_s6] ss:$0 sm:$0xff] }
 0x3b6   : > { %v814_v24 = vpack.c.bf16 %v813_v20, %v813_v20 }
 0x3b9   : > { %1454 = vmatmul.mubr.msk.bf16.vlgmr.msra.gmra.mrb[8].mxu0 %vm525_vm2, %v697_v17  ;;  %v1586_v17 = vld [vmem:[%s2077_s7 + $0x18] sm:$0xff]  }
 0x3ba   : > { %1465 = vmatprep.mubr.msk.bf16.mxu0 %vm1707_vm0, %v1706_v0 }
 0x3d5   : > { %v928_v19 = vpop.xlane.xlu1 %927 }
 0x3d6   : > { %1601 = vrcp.f32 %v928_v19 }
 0x3d9   : > { %v816_v21 = vpop.permute.xlu1 %815 }
 0x3da   : > { %v821_v22 = vsel %vm590_vm3, %v816_v21, 0 }
 0x3db   : > { %1464 = vmatpush3.bf16.msra.mxu0 %v821_v22 }
 0x3dc   : > { %1475 = vmatprep.subr.bf16.mxu0 %v1706_v0 }
 0x3de   : > { %1466 = vmatmul.mubr.msk.bf16.vlgmr.msra.gmra.mrb[12].mxu0 %vm525_vm2, %v814_v24 }
 0x3df   : > { %1476 = vmatpush3.bf16.msra.mxu0 %v938_v25  ;;  %1477 = vmatprep.mubr.msk.bf16.mxu0 %vm1707_vm0, %v1706_v0 }
 0x3e0   : > { %v1602_v26 = vpop.eup %1601  ;;  %1489 = vmatprep.subr.bf16.mxu0 %v1706_v0 }
 0x3e1   : > { %v930_v27 = vmul.f32 %v1602_v26, %v1594_v2  ;;  %v1581_v2 = vld [vmem:[#allocation3] sm:$0xff]  }
 0x3e3   : > { %v931_v28 = vpack.c.bf16 %v930_v27, %v930_v27 }
 0x3e6   : > { %1478 = vmatmul.mubr.msk.bf16.vlgmr.msra.gmra.mrb[16].mxu0 %vm525_vm2, %v931_v28 }
 0x3e7   : > { %1493 = vmatprep.mubr.msk.bf16.mxu0 %vm1707_vm0, %v1706_v0  ;;  %1490 = vmatpush3.bf16.msra.mxu0 %v1581_v2 }
 0x3e8   : > { %1491 = vmatprep.subr.bf16.mxu0 %v1706_v0 }
 0x3eb   : > { %1492 = vmatpush3.bf16.msra.mxu0 %v1582_v4 }
 0x484   : > { %v628_v29 = vpop.f32.mrb[4].mxu0 }
 0x485   : > { %634 = vst.msk [vmem:[#allocation2] sm:$0xff] %vm525_vm2, %v628_v29  ;;  %v1443_v30 = vpop.f32.mrb[5].mxu0 }
 0x486   : > { %v631_v31 = vpop.f32.mrb[6].mxu0 }
 0x487   : > { %v1444_v32 = vpop.f32.mrb[7].mxu0 }
 0x48c   : > { %v740_v33 = vpop.f32.mrb[8].mxu0 }
 0x48d   : > { %747 = vrot.lane.b32.xlu1 %v740_v33, %s1719_s27  ;;  %v1455_v34 = vpop.f32.mrb[9].mxu0  ;;  %s1282_s27 = sshll.u32 %s446_s16, 4  ;;  %s2029_s27 = int_to_ptr.vmem [resolvable:$true] %s1282_s27 }
 0x48e   : > { %v743_v35 = vpop.f32.mrb[10].mxu0  ;;  %p1642_p2 = scmp.lt.s32.totalorder %s2029_s27, %s1640_s23 }
 0x48f   : > { %v1456_v36 = vpop.f32.mrb[11].mxu0 }
 0x4b1   : > { %v857_v39 = vpop.f32.mrb[12].mxu0 }
 0x4b2   : > { %864 = vrot.lane.b32.xlu0 %v857_v39, %s1720_s15  ;;  %v1467_v40 = vpop.f32.mrb[13].mxu0  ;;  %s1269_s15 = scalar_lea.sflag [#allocation5], %s444_s22 }
 0x4b3   : > { %v860_v41 = vpop.f32.mrb[14].mxu0 }
 0x4b4   : > { %v1468_v42 = vpop.f32.mrb[15].mxu0 }
 0x4b5   : > { %v1389_v42 = vld [vmem:[%s2081_s11] ss:$0 sm:$0xff] }
 0x4b9   : > { %v974_v43 = vpop.f32.mrb[16].mxu0 }
 0x4ba   : > { %981 = vrot.lane.b32.xlu1 %v974_v43, %s1721_s21  ;;  %v1479_v44 = vpop.f32.mrb[17].mxu0  ;;  %s1635_s21 = scalar_lea.vmem %s2029_s27, 128 }
 0x4bb   : > { %v977_v45 = vpop.f32.mrb[18].mxu0  ;;  %v1390_v44 = vld [vmem:[%s2082_s12] ss:$0 sm:$0xff]  ;;  %p1636_p6 = scmp.ne.s32.totalorder %s2029_s27, %s1635_s21  ;;  %p1643_p3 = scmp.lt.s32.totalorder %s1641_s17, %s1635_s21 }
 0x4bc   : > { %v1480_v46 = vpop.f32.mrb[19].mxu0 }
 0x4bd   : > { %p1637_p10 = pnand %p1636_p6, %p2102_p9  ;;  %p1644_p4 = por %p1643_p3, %p1642_p2 }
 0x4bf   : > { %p1638_p12 = pneg %p1637_p10 }
 0x4c1   : > { %p1645_p7 = pnand %p1644_p4, %p1638_p12 }
 0x4ff   : > { %v748_v47 = vpop.permute.xlu1 %747 }
 0x500   : > { %751 = vst.msk [vmem:[#allocation2] sm:$0xff] %vm750_vm4, %v748_v47 }
 0x524   : > { %v865_v48 = vpop.permute.xlu0 %864 }
 0x525   : > { %868 = vst.msk [vmem:[#allocation2] sm:$0xff] %vm867_vm5, %v865_v48 }
 0x52c   : > { %v982_v49 = vpop.permute.xlu1 %981 }
 0x52d   : > { %985 = vst.msk [vmem:[#allocation2] sm:$0xff] %vm984_vm6, %v982_v49 }
 0x534   : > { %v986_v50 = vld [vmem:[#allocation2] sm:$0xff] }
 0x535   : > { %v987_v51 = vpack.c.bf16 %v986_v50, %v986_v50 }
 0x537   : > { %1486 = vmatmul.mubr.msk.bf16.vlgmr.msra.gmra.mrb[16].mxu1 %vm477_vm1, %v987_v51 }
 0x538   : > { %1505 = vmatprep.mubr.msk.bf16.mxu1 %vm1707_vm0, %v1706_v0 }
 0x60a   : > { %v1048_v53 = vpop.f32.mrb[16].mxu1 }
 0x60b   : > { %v1049_v54 = vadd.f32 %v1373_v52, %v1048_v53  ;;  %v1487_v55 = vpop.f32.mrb[17].mxu1 }
 0x60c   : > { %v1051_v56 = vpop.f32.mrb[18].mxu1 }
 0x60d   : > { %v1488_v57 = vpop.f32.mrb[19].mxu1  ;;  %v1054_v58 = vadd.f32 %v1049_v54, %v1893_v3  ;;  %v1583_v3 = vld [vmem:[%s2077_s7] sm:$0xff]  }
 0x60e   : > { %1498 = vmatpush3.bf16.msra.mxu1 %v1583_v3 }
 0x60f   : > { %v1057_v59 = vsel %vm477_vm1, %v1054_v58, 0.0  ;;  %1499 = vmatprep.subr.bf16.mxu1 %v1706_v0 }
 0x610   : > { %1058 = vadd.xlane.f32.xlu0 %v1057_v59 }
 0x612   : > { %1500 = vmatpush3.bf16.msra.mxu1 %v1584_v5 }
 0x613   : > { %1501 = vmatprep.subr.bf16.mxu1 %v1706_v0 }
 0x616   : > { %1502 = vmatpush3.bf16.msra.mxu1 %v1585_v10 }
 0x617   : > { %1503 = vmatprep.subr.bf16.mxu1 %v1706_v0  ;;  %v1383_v0 = vld [vmem:[%s2078_s8] ss:$0 sm:$0xff] }
 0x61a   : > { %1504 = vmatpush3.bf16.msra.mxu1 %v1586_v17 }
 0x69d   : > { %v1059_v60 = vpop.xlane.xlu0 %1058 }
 0x69e   : > { %v1061_v61 = vmul.f32 0.03125, %v1059_v60 }
 0x6a0   : > { %v1062_v62 = vsub.f32 %v1054_v58, %v1061_v61 }
 0x6a2   : > { %v1063_v63 = vmul.f32 %v1062_v62, %v1062_v62 }
 0x6a4   : > { %v1064_v1 = vsel %vm477_vm1, %v1063_v63, 0.0 }
 0x6a5   : > { %1065 = vadd.xlane.f32.xlu1 %v1064_v1 }
 0x732   : > { %v1066_v6 = vpop.xlane.xlu1 %1065 }
 0x733   : > { %v1067_v7 = vmul.f32 0.03125, %v1066_v6 }
 0x735   : > { %v1068_v8 = vadd.f32 1e-05, %v1067_v7 }
 0x737   : > { %1603 = vrsqrt.f32 %v1068_v8 }
 0x741   : > { %v1604_v9 = vpop.eup %1603 }
 0x742   : > { %v1070_v12 = vmul.f32 %v1604_v9, %v1062_v62 }
 0x744   : > { %v1077_v14 = vmul.f32 %v1377_v11, %v1070_v12 }
 0x746   : > { %v1084_v15 = vadd.f32 %v1378_v13, %v1077_v14 }
 0x748   : > { %v1085_v16 = vpack.c.bf16 %v1084_v15, %v1084_v15 }
 0x74a   : > { %1494 = vmatmul.mubr.msk.bf16.vlgmr.msra.gmra.mrb[20].mxu0 %vm477_vm1, %v1085_v16 }
 0x81d   : > { %v1146_v19 = vpop.f32.mrb[20].mxu0 }
 0x81e   : > { %v1147_v20 = vadd.f32 %v1379_v18, %v1146_v19  ;;  %v1495_v21 = vpop.f32.mrb[21].mxu0 }
 0x81f   : > { %v1149_v22 = vpop.f32.mrb[22].mxu0 }
 0x820   : > { %v1152_v23 = vmax.f32 %v1147_v20, 0.0  ;;  %v1496_v24 = vpop.f32.mrb[23].mxu0 }
 0x822   : > { %v1153_v25 = vpack.c.bf16 %v1152_v23, %v1152_v23 }
 0x824   : > { %1506 = vmatmul.mubr.msk.bf16.vlgmr.msra.gmra.mrb[20].mxu1 %vm1193_vm7, %v1153_v25 }
 0x8f7   : > { %v1231_v26 = vpop.f32.mrb[20].mxu1 }
 0x8f8   : > { %v1232_v27 = vadd.f32 %v1383_v0, %v1231_v26  ;;  %v1507_v28 = vpop.f32.mrb[21].mxu1 }
 0x8f9   : > { %v1234_v29 = vpop.f32.mrb[22].mxu1 }
 0x8fa   : > { %v1508_v30 = vpop.f32.mrb[23].mxu1  ;;  %v1237_v31 = vadd.f32 %v1232_v27, %v1084_v15 }
 0x8fc   : > { %v1240_v32 = vsel %vm477_vm1, %v1237_v31, 0.0 }
 0x8fd   : > { %1241 = vadd.xlane.f32.xlu0 %v1240_v32 }
 0x98a   : > { %v1242_v33 = vpop.xlane.xlu0 %1241 }
 0x98b   : > { %v1243_v34 = vmul.f32 0.03125, %v1242_v33 }
 0x98d   : > { %v1244_v35 = vsub.f32 %v1237_v31, %v1243_v34 }
 0x98f   : > { %v1245_v36 = vmul.f32 %v1244_v35, %v1244_v35 }
 0x991   : > { %v1246_v37 = vsel %vm477_vm1, %v1245_v36, 0.0 }
 0x992   : > { %1247 = vadd.xlane.f32.xlu0 %v1246_v37 }
 0xa1f   : > { %v1248_v38 = vpop.xlane.xlu0 %1247 }
 0xa20   : > { %v1249_v39 = vmul.f32 0.03125, %v1248_v38 }
 0xa22   : > { %v1250_v40 = vadd.f32 1e-05, %v1249_v39 }
 0xa24   : > { %1605 = vrsqrt.f32 %v1250_v40 }
 0xa2e   : > { %v1606_v41 = vpop.eup %1605 }
 0xa2f   : > { %v1252_v43 = vmul.f32 %v1606_v41, %v1244_v35 }
 0xa31   : > { %v1259_v45 = vmul.f32 %v1389_v42, %v1252_v43 }
 0xa33   : > { %v1266_v46 = vadd.f32 %v1390_v44, %v1259_v45 }
 0xa35   : > { %1267 = vst.msk [vmem:[%s446_s16] sm:$0xff] %vm477_vm1, %v1266_v46 }
 0xa36   : > { %1648 = shalt.err (!%p1645_p7)
}
 0xa37   : > { %s1649_s22 = scalar_lea.hbm %s2027_s0, 128  ;;  %s1653_s16 = scalar_lea.hbm %s2083_s13, 256 }
 0xa38   : > { %p1650_p8 = scmp.ne.s32.totalorder %s2027_s0, %s1649_s22  ;;  %p1654_p1 = scmp.lt.u32.totalorder %s2027_s0, %s2083_s13 }
 0xa39   : > { %p1655_p0 = scmp.lt.u32.totalorder %s1653_s16, %s1649_s22  ;;  %p1657_p6 = scmp.lt.u32.totalorder %s1649_s22, %s2027_s0 }
 0xa3a   : > { %p1651_p11 = pnand %p1650_p8, %p2102_p9 }
 0xa3b   : > { %p1656_p5 = por %p1655_p0, %p1654_p1 }
 0xa3c   : > { %p1652_p13 = pneg %p1651_p11 }
 0xa3d   : > { %p1658_p10 = por %p1657_p6, %p1656_p5 }
 0xa3f   : > { %p1659_p12 = pnand %p1658_p10, %p1652_p13 }
 0xa41   : > { %1662 = shalt.err (!%p1659_p12)
}
 0xa42   : > { %1513 = dma.vmem_to_hbm [thread:$0]  (%p2102_p9), %s2029_s27, 128, %s2027_s0, %s1269_s15  }
 0xa43 PF: > { %p1525_p2 = scmp.ge.s32.totalorder %s1701_s28, 2  ;;  %s1294_s21 = sand.u32 1, %s1689_s25  }
 0xa44   : > { %p2103_p3 = scmp.ne.s32.totalorder %s2095_s19, 0  ;;  %s1295_s29 = scalar_lea.sflag [#allocation5], %s1294_s21 }
 0xa46   : > { %p1520_p4 = pnand %p1525_p2, %p2103_p3 }
 0xa48   : > { %1684 = dma.done.wait (!%p1520_p4), %s1295_s29, 128  }
 0xa49   : > { %1686 = vsyncadd (!%p1520_p4), %s1295_s29, 4294967168  ;;  %s2104_s28 = sld [smem:[#allocation10_spill]]  ;;  %s2105_s23 = sld [smem:[#allocation9_spill]] }
 0xa4a   : > { %s2106_s27 = sld [smem:[#allocation11_spill]]  ;;  %s2107_s25 = smov %s1693_s26 }
 0xa4f   : > { %p24_p7 = scmp.ge.s32.totalorder %s2104_s28, 4   ;;  %s2108_s26 = smov %s2105_s23 }
 0xa51   :  { %26 = sbr.rel (!%p24_p7) target bundleno = 6 (0x6), region = 112 }
 0xa58   :  { %1300 = vsyncpa [#allocation4], 1 }
 0xa59   :  { %1302 = vsyncpa [#allocation4 + $0x1], 1 }
 0xa5a   :  { %1303 = vsyncpa [#allocation5], 1 }
 0xa5b   :  { %1305 = vsyncpa [#allocation5 + $0x1], 1 }

</bundles_post_ra>
